<compile_context>
chip_gen: v5e
topology: v5e:2x2
jax: 0.10.0
libtpu: 0.0.40
codegen_flags: <defaults>
</compile_context>

<pallas_src>
import functools

import numpy as np

import jax
import jax.numpy as jnp
from jax.experimental import pallas as pl
from jax.experimental.pallas import tpu as pltpu


# ------------------------------- kernel -------------------------------------

def _lenet_kernel(x_ref, w1_ref, b1_ref, w2_ref, b2_ref, a1_ref, a2_ref,
                  fw1_ref, fb1_ref, fw2_ref, fb2_ref, fw3_ref, fb3_ref,
                  out_ref, s1_ref, s2_ref, s3_ref, *, tile_b):
    f32 = jnp.float32
    bf16 = jnp.bfloat16
    B = tile_b
    R0 = 32 * B - 2          # conv1 rows (per-image stride 32, h < 28 valid)
    R1 = 16 * B - 2          # conv2 rows (per-image stride 16, x < 12 valid)

    # ---- conv1 (1->6, 3x3): one wide-K dot (K=90) ---------------------------
    x = x_ref[...]                                                 # (32B, 30) f32
    lhs1 = jnp.concatenate([x[0:R0, :], x[1:R0 + 1, :], x[2:R0 + 2, :]],
                           axis=1).astype(bf16)                    # (R0, 90)
    c1 = jnp.dot(lhs1, w1_ref[...], preferred_element_type=f32)    # (R0, 168)
    c1 = jnp.maximum(c1 + b1_ref[...], 0.0)

    # ---- pool1: adjacent max + lane-select dot + stride-2 sublane read ------
    m = jnp.maximum(c1[0:R0 - 1, :], c1[1:R0, :])                  # (R0-1, 168)
    m = jnp.maximum(m[:, 0:167], m[:, 1:168])                      # (R0-1, 167)
    q1 = jnp.dot(m.astype(bf16), a1_ref[...], preferred_element_type=f32)
    s1_ref[0:R0 - 1, :] = q1                                       # (R0-1, 84)
    s1_ref[R0 - 1:32 * B, :] = jnp.zeros((3, 84), f32)             # finite tail
    p1 = s1_ref[pl.ds(0, 16 * B, stride=2), :]                     # (16B, 84)

    # ---- conv2 (6->16, 3x3): one wide-K dot (K=252) -------------------------
    lhs2 = jnp.concatenate([p1[0:R1, :], p1[1:R1 + 1, :], p1[2:R1 + 2, :]],
                           axis=1).astype(bf16)                    # (R1, 252)
    c2 = jnp.dot(lhs2, w2_ref[...], preferred_element_type=f32)    # (R1, 192)
    c2 = jnp.maximum(c2 + b2_ref[...], 0.0)

    # ---- pool2 ---------------------------------------------------------------
    m2 = jnp.maximum(c2[0:R1 - 1, :], c2[1:R1, :])                 # (R1-1, 192)
    m2 = jnp.maximum(m2[:, 0:191], m2[:, 1:192])                   # (R1-1, 191)
    q2 = jnp.dot(m2.astype(bf16), a2_ref[...], preferred_element_type=f32)
    s2_ref[0:R1 - 1, :] = q2                                       # (R1-1, 96)
    s2_ref[R1 - 1:16 * B, :] = jnp.zeros((3, 96), f32)

    # ---- flatten: gather 6 valid pooled rows per image -> (B, 576) ----------
    # lane order h*96 + c*6 + w matches the host-packed fc1 weight rows.
    for h in range(6):
        s3_ref[:, h * 96:(h + 1) * 96] = s2_ref[pl.ds(2 * h, B, stride=16), :]

    # ---- fc1 + ReLU, fc2 + ReLU, fc3 (single K=576 / 128 / 128 dots) --------
    h1 = jnp.dot(s3_ref[...].astype(bf16), fw1_ref[...],
                 preferred_element_type=f32) + fb1_ref[...]
    h1 = jnp.maximum(h1, 0.0)                                      # (B, 128)
    h2 = jnp.dot(h1.astype(bf16), fw2_ref[...],
                 preferred_element_type=f32) + fb2_ref[...]
    h2 = jnp.maximum(h2, 0.0)                                      # (B, 128)
    out_ref[...] = (jnp.dot(h2.astype(bf16), fw3_ref[...],
                            preferred_element_type=f32) + fb3_ref[...])


# --------------------- host-side constant preparation -----------------------

def init_params(key):
    """PyTorch-layout parameters with uniform(-1/sqrt(fan_in), +) init."""
    def uni(k, shape, fan_in):
        bound = 1.0 / np.sqrt(float(fan_in))
        return jax.random.uniform(k, shape, jnp.float32, -bound, bound)

    ks = jax.random.split(key, 10)
    return {
        "conv1_w": uni(ks[0], (6, 1, 3, 3), 9),
        "conv1_b": uni(ks[1], (6,), 9),
        "conv2_w": uni(ks[2], (16, 6, 3, 3), 54),
        "conv2_b": uni(ks[3], (16,), 54),
        "fc1_w": uni(ks[4], (120, 576), 576),
        "fc1_b": uni(ks[5], (120,), 576),
        "fc2_w": uni(ks[6], (84, 120), 120),
        "fc2_b": uni(ks[7], (84,), 120),
        "fc3_w": uni(ks[8], (10, 84), 84),
        "fc3_b": uni(ks[9], (10,), 84),
    }


def pack_params(p):
    """Convert PyTorch-layout weights into the kernel's matmul layouts (bf16)."""
    w1 = np.asarray(p["conv1_w"], np.float32); b1 = np.asarray(p["conv1_b"], np.float32)
    w2 = np.asarray(p["conv2_w"], np.float32); b2 = np.asarray(p["conv2_b"], np.float32)
    fw1 = np.asarray(p["fc1_w"], np.float32);  fb1 = np.asarray(p["fc1_b"], np.float32)
    fw2 = np.asarray(p["fc2_w"], np.float32);  fb2 = np.asarray(p["fc2_b"], np.float32)
    fw3 = np.asarray(p["fc3_w"], np.float32);  fb3 = np.asarray(p["fc3_b"], np.float32)

    # conv1 as one (90, 168) matmul: row = di*30 + (w+dj), col = oc*28 + w.
    W1 = np.zeros((90, 6 * 28), np.float32)
    for di in range(3):
        for dj in range(3):
            for oc in range(6):
                for w in range(28):
                    W1[di * 30 + w + dj, oc * 28 + w] = w1[oc, 0, di, dj]
    b1row = np.zeros((1, 6 * 28), np.float32)
    for oc in range(6):
        b1row[0, oc * 28:(oc + 1) * 28] = b1[oc]

    # conv2 as one (252, 192) matmul: row = di*84 + ic*14 + (x+dj), col = oc*12 + x.
    W2 = np.zeros((252, 16 * 12), np.float32)
    for di in range(3):
        for dj in range(3):
            for ic in range(6):
                for oc in range(16):
                    for xx in range(12):
                        W2[di * 84 + ic * 14 + xx + dj, oc * 12 + xx] = w2[oc, ic, di, dj]
    b2row = np.zeros((1, 16 * 12), np.float32)
    for oc in range(16):
        b2row[0, oc * 12:(oc + 1) * 12] = b2[oc]

    # 0/1 lane-selection matrices for the pools' stride-2 column decimation
    # (B-independent; exact in bf16).
    A1 = np.zeros((167, 6 * 14), np.float32)
    for oc in range(6):
        for j in range(14):
            A1[oc * 28 + 2 * j, oc * 14 + j] = 1.0
    A2 = np.zeros((191, 16 * 6), np.float32)
    for oc in range(16):
        for j in range(6):
            A2[oc * 12 + 2 * j, oc * 6 + j] = 1.0

    # fc1: torch feature order is c*36 + h*6 + w; kernel lane order is
    # h*96 + c*6 + w.  Pad out dim to 128 with zero columns.
    fw1p = fw1.reshape(120, 16, 6, 6).transpose(2, 1, 3, 0).reshape(576, 120)
    fw1p = np.pad(fw1p, ((0, 0), (0, 8)))                          # (576, 128)
    fb1p = np.pad(fb1, (0, 8)).reshape(1, 128)

    fw2p = np.zeros((128, 128), np.float32); fw2p[:120, :84] = fw2.T
    fb2p = np.zeros((1, 128), np.float32);   fb2p[0, :84] = fb2
    fw3p = np.zeros((128, 10), np.float32);  fw3p[:84, :] = fw3.T
    fb3p = fb3.reshape(1, 10)

    bf = jnp.bfloat16
    return dict(
        w1=jnp.asarray(W1, bf), b1=jnp.asarray(b1row, jnp.float32),
        w2=jnp.asarray(W2, bf), b2=jnp.asarray(b2row, jnp.float32),
        a1=jnp.asarray(A1, bf), a2=jnp.asarray(A2, bf),
        fw1=jnp.asarray(fw1p, bf), fb1=jnp.asarray(fb1p, jnp.float32),
        fw2=jnp.asarray(fw2p, bf), fb2=jnp.asarray(fb2p, jnp.float32),
        fw3=jnp.asarray(fw3p, bf), fb3=jnp.asarray(fb3p, jnp.float32),
    )


# ------------------------------ forward pass --------------------------------

def net_forward(packed, x_nchw, tile_b=32):
    n = x_nchw.shape[0]
    assert x_nchw.shape[1:] == (1, 30, 30), x_nchw.shape
    B = int(min(tile_b, n))
    n_pad = -(-n // B) * B
    if n_pad > B:
        assert B % 8 == 0, "tile_b must be a multiple of 8 when the batch is tiled"
    # NOTE(v7x): with >=2 grid steps the "parallel" batch axis is sharded
    # across both TensorCores; single-step batches inevitably use one core.

    # per-image row stride of 32 (30 valid rows + 2 zero rows): keeps every
    # pooling / gather stride a power of two and sublane-aligned.
    x = x_nchw.reshape(n, 30, 30)
    x = jnp.pad(x, ((0, n_pad - n), (0, 2), (0, 0)))
    x2d = x.reshape(n_pad * 32, 30)

    c2d = lambda i: (0, 0)   # weights / constants stay resident across the grid

    out = pl.pallas_call(
        functools.partial(_lenet_kernel, tile_b=B),
        out_shape=jax.ShapeDtypeStruct((n_pad, 10), jnp.float32),
        grid=(n_pad // B,),
        in_specs=[
            pl.BlockSpec((32 * B, 30), lambda i: (i, 0)),   # input tile
            pl.BlockSpec((90, 168), c2d),                   # conv1 weight
            pl.BlockSpec((1, 168), c2d),                    # conv1 bias
            pl.BlockSpec((252, 192), c2d),                  # conv2 weight
            pl.BlockSpec((1, 192), c2d),                    # conv2 bias
            pl.BlockSpec((167, 84), c2d),                   # pool1 lane selection
            pl.BlockSpec((191, 96), c2d),                   # pool2 lane selection
            pl.BlockSpec((576, 128), c2d),                  # fc1 weight (padded)
            pl.BlockSpec((1, 128), c2d),                    # fc1 bias
            pl.BlockSpec((128, 128), c2d),                  # fc2 weight
            pl.BlockSpec((1, 128), c2d),                    # fc2 bias
            pl.BlockSpec((128, 10), c2d),                   # fc3 weight
            pl.BlockSpec((1, 10), c2d),                     # fc3 bias
        ],
        out_specs=pl.BlockSpec((B, 10), lambda i: (i, 0)),
        scratch_shapes=[
            pltpu.VMEM((32 * B, 84), jnp.float32),          # pool1 staging
            pltpu.VMEM((16 * B, 96), jnp.float32),          # pool2 staging
            pltpu.VMEM((B, 576), jnp.float32),              # flattened fc1 input
        ],
        compiler_params=pltpu.CompilerParams(
            dimension_semantics=("parallel",),
            vmem_limit_bytes=48 * 1024 * 1024),
    )(x2d, packed["w1"], packed["b1"], packed["w2"], packed["b2"],
      packed["a1"], packed["a2"],
      packed["fw1"], packed["fb1"], packed["fw2"], packed["fb2"],
      packed["fw3"], packed["fb3"])
    return out[:n]


# ------------------------- pure-JAX reference (check) ------------------------

def reference_forward(p, x):
    def conv(x, w, b):
        y = jax.lax.conv_general_dilated(
            x, w, window_strides=(1, 1), padding="VALID",
            dimension_numbers=("NCHW", "OIHW", "NCHW"))
        return y + b[None, :, None, None]

    def pool(y):
        n, c, h, w = y.shape
        return y.reshape(n, c, h // 2, 2, w // 2, 2).max(axis=(3, 5))

    y = pool(jnp.maximum(conv(x, p["conv1_w"], p["conv1_b"]), 0.0))
    y = pool(jnp.maximum(conv(y, p["conv2_w"], p["conv2_b"]), 0.0))
    y = y.reshape(y.shape[0], -1)                        # NCHW flatten (C,H,W)
    y = jnp.maximum(y @ p["fc1_w"].T + p["fc1_b"], 0.0)
    y = jnp.maximum(y @ p["fc2_w"].T + p["fc2_b"], 0.0)
    return y @ p["fc3_w"].T + p["fc3_b"]


if __name__ == "__main__":
    key = jax.random.PRNGKey(0)
    k_params, k_x = jax.random.split(key)

    torch_params = init_params(k_params)
    packed = pack_params(torch_params)

    # input implied by fc1 = Linear(16*6*6, 120): 1 channel, 30x30 spatial
    x = jax.random.normal(k_x, (2, 1, 30, 30), dtype=jnp.float32)

    out = jax.jit(net_forward)(packed, x)
    out = jax.block_until_ready(out)
    assert out.shape == (2, 10), out.shape

    ref = jax.block_until_ready(reference_forward(torch_params, x))
    err = float(jnp.max(jnp.abs(out - ref)))
    # bf16 MXU operands (weights + activations) -> looser tolerance than an
    # all-f32 build (which sits at ~1e-5).
    assert err < 5e-2, f"mismatch vs reference: max abs err = {err}"

    print("KERNEL_OK")
</pallas_src>

<mosaic_0001>
module attributes {stable_mosaic.version = 11 : i64} {
  func.func @_lenet_kernel(%arg0: i32, %arg1: memref<64x30xf32, #tpu.memory_space<vmem>>, %arg2: memref<90x168xbf16, #tpu.memory_space<vmem>>, %arg3: memref<1x168xf32, #tpu.memory_space<vmem>>, %arg4: memref<252x192xbf16, #tpu.memory_space<vmem>>, %arg5: memref<1x192xf32, #tpu.memory_space<vmem>>, %arg6: memref<167x84xbf16, #tpu.memory_space<vmem>>, %arg7: memref<191x96xbf16, #tpu.memory_space<vmem>>, %arg8: memref<576x128xbf16, #tpu.memory_space<vmem>>, %arg9: memref<1x128xf32, #tpu.memory_space<vmem>>, %arg10: memref<128x128xbf16, #tpu.memory_space<vmem>>, %arg11: memref<1x128xf32, #tpu.memory_space<vmem>>, %arg12: memref<128x10xbf16, #tpu.memory_space<vmem>>, %arg13: memref<1x10xf32, #tpu.memory_space<vmem>>, %arg14: memref<2x10xf32, #tpu.memory_space<vmem>>, %arg15: memref<64x84xf32, #tpu.memory_space<vmem>>, %arg16: memref<32x96xf32, #tpu.memory_space<vmem>>, %arg17: memref<2x576xf32, #tpu.memory_space<vmem>>) attributes {dimension_semantics = [#tpu.dimension_semantics<parallel>], iteration_bounds = array<i64: 1>, scalar_prefetch = 0 : i64, scratch_operands = 3 : i64, tpu.core_type = #tpu.core_type<tc>, window_params = [{transform_indices = @transform_0, window_bounds = array<i64: 64, 30>}, {pipeline_mode = #tpu.pipeline_mode<synchronous>, transform_indices = @transform_1, window_bounds = array<i64: 90, 168>}, {pipeline_mode = #tpu.pipeline_mode<synchronous>, transform_indices = @transform_2, window_bounds = array<i64: 1, 168>}, {pipeline_mode = #tpu.pipeline_mode<synchronous>, transform_indices = @transform_3, window_bounds = array<i64: 252, 192>}, {pipeline_mode = #tpu.pipeline_mode<synchronous>, transform_indices = @transform_4, window_bounds = array<i64: 1, 192>}, {pipeline_mode = #tpu.pipeline_mode<synchronous>, transform_indices = @transform_5, window_bounds = array<i64: 167, 84>}, {pipeline_mode = #tpu.pipeline_mode<synchronous>, transform_indices = @transform_6, window_bounds = array<i64: 191, 96>}, {pipeline_mode = #tpu.pipeline_mode<synchronous>, transform_indices = @transform_7, window_bounds = array<i64: 576, 128>}, {pipeline_mode = #tpu.pipeline_mode<synchronous>, transform_indices = @transform_8, window_bounds = array<i64: 1, 128>}, {pipeline_mode = #tpu.pipeline_mode<synchronous>, transform_indices = @transform_9, window_bounds = array<i64: 128, 128>}, {pipeline_mode = #tpu.pipeline_mode<synchronous>, transform_indices = @transform_10, window_bounds = array<i64: 1, 128>}, {pipeline_mode = #tpu.pipeline_mode<synchronous>, transform_indices = @transform_11, window_bounds = array<i64: 128, 10>}, {pipeline_mode = #tpu.pipeline_mode<synchronous>, transform_indices = @transform_12, window_bounds = array<i64: 1, 10>}, {transform_indices = @transform_13, window_bounds = array<i64: 2, 10>}]} {
    %c0 = arith.constant 0 : index
    %c0_0 = arith.constant 0 : index
    %0 = vector.load %arg1[%c0, %c0_0] : memref<64x30xf32, #tpu.memory_space<vmem>>, vector<64x30xf32>
    %1 = vector.extract_strided_slice %0 {offsets = [0, 0], sizes = [62, 30], strides = [1, 1]} : vector<64x30xf32> to vector<62x30xf32>
    %2 = vector.extract_strided_slice %0 {offsets = [1, 0], sizes = [62, 30], strides = [1, 1]} : vector<64x30xf32> to vector<62x30xf32>
    %3 = vector.extract_strided_slice %0 {offsets = [2, 0], sizes = [62, 30], strides = [1, 1]} : vector<64x30xf32> to vector<62x30xf32>
    %4 = tpu.concatenate %1, %2, %3 in 1 : vector<62x30xf32>, vector<62x30xf32>, vector<62x30xf32> -> vector<62x90xf32>
    %5 = arith.truncf %4 : vector<62x90xf32> to vector<62x90xbf16>
    %c0_1 = arith.constant 0 : index
    %c0_2 = arith.constant 0 : index
    %6 = vector.load %arg2[%c0_1, %c0_2] : memref<90x168xbf16, #tpu.memory_space<vmem>>, vector<90x168xbf16>
    %cst = arith.constant dense<0.000000e+00> : vector<62x168xf32>
    %7 = tpu.matmul %5, %6, %cst {dimension_numbers = #tpu.dot_dimension_numbers<[1], [0], [0], [1], [0, 0, 1, 1], [], []>} : vector<62x90xbf16>, vector<90x168xbf16>, vector<62x168xf32> -> vector<62x168xf32>
    %c0_3 = arith.constant 0 : index
    %c0_4 = arith.constant 0 : index
    %8 = vector.load %arg3[%c0_3, %c0_4] : memref<1x168xf32, #tpu.memory_space<vmem>>, vector<1x168xf32>
    %9 = vector.broadcast %8 : vector<1x168xf32> to vector<62x168xf32>
    %10 = arith.addf %7, %9 : vector<62x168xf32>
    %cst_5 = arith.constant 0.000000e+00 : f32
    %11 = vector.broadcast %cst_5 : f32 to vector<62x168xf32>
    %12 = arith.maximumf %10, %11 : vector<62x168xf32>
    %13 = vector.extract_strided_slice %12 {offsets = [0, 0], sizes = [61, 168], strides = [1, 1]} : vector<62x168xf32> to vector<61x168xf32>
    %14 = vector.extract_strided_slice %12 {offsets = [1, 0], sizes = [61, 168], strides = [1, 1]} : vector<62x168xf32> to vector<61x168xf32>
    %15 = arith.maximumf %13, %14 : vector<61x168xf32>
    %16 = vector.extract_strided_slice %15 {offsets = [0, 0], sizes = [61, 167], strides = [1, 1]} : vector<61x168xf32> to vector<61x167xf32>
    %17 = vector.extract_strided_slice %15 {offsets = [0, 1], sizes = [61, 167], strides = [1, 1]} : vector<61x168xf32> to vector<61x167xf32>
    %18 = arith.maximumf %16, %17 : vector<61x167xf32>
    %19 = arith.truncf %18 : vector<61x167xf32> to vector<61x167xbf16>
    %c0_6 = arith.constant 0 : index
    %c0_7 = arith.constant 0 : index
    %20 = vector.load %arg6[%c0_6, %c0_7] : memref<167x84xbf16, #tpu.memory_space<vmem>>, vector<167x84xbf16>
    %cst_8 = arith.constant dense<0.000000e+00> : vector<61x84xf32>
    %21 = tpu.matmul %19, %20, %cst_8 {dimension_numbers = #tpu.dot_dimension_numbers<[1], [0], [0], [1], [0, 0, 1, 1], [], []>} : vector<61x167xbf16>, vector<167x84xbf16>, vector<61x84xf32> -> vector<61x84xf32>
    %c0_9 = arith.constant 0 : index
    %c0_10 = arith.constant 0 : index
    %22 = vector.load %arg15[%c0_9, %c0_10] : memref<64x84xf32, #tpu.memory_space<vmem>>, vector<61x84xf32>
    tpu.vector_store %arg15[%c0_9, %c0_10], %21 {strides = array<i32>} : memref<64x84xf32, #tpu.memory_space<vmem>>, vector<61x84xf32>,
    %cst_11 = arith.constant 0.000000e+00 : f32
    %23 = vector.broadcast %cst_11 : f32 to vector<3x84xf32>
    %c61 = arith.constant 61 : index
    %c0_12 = arith.constant 0 : index
    %24 = vector.load %arg15[%c61, %c0_12] : memref<64x84xf32, #tpu.memory_space<vmem>>, vector<3x84xf32>
    tpu.vector_store %arg15[%c61, %c0_12], %23 {strides = array<i32>} : memref<64x84xf32, #tpu.memory_space<vmem>>, vector<3x84xf32>,
    %c0_13 = arith.constant 0 : index
    %c0_14 = arith.constant 0 : index
    %25 = tpu.strided_load %arg15[%c0_13, %c0_14] {strides = array<i32: 2, 1>} : memref<64x84xf32, #tpu.memory_space<vmem>>, vector<32x84xf32>
    %26 = vector.extract_strided_slice %25 {offsets = [0, 0], sizes = [30, 84], strides = [1, 1]} : vector<32x84xf32> to vector<30x84xf32>
    %27 = vector.extract_strided_slice %25 {offsets = [1, 0], sizes = [30, 84], strides = [1, 1]} : vector<32x84xf32> to vector<30x84xf32>
    %28 = vector.extract_strided_slice %25 {offsets = [2, 0], sizes = [30, 84], strides = [1, 1]} : vector<32x84xf32> to vector<30x84xf32>
    %29 = tpu.concatenate %26, %27, %28 in 1 : vector<30x84xf32>, vector<30x84xf32>, vector<30x84xf32> -> vector<30x252xf32>
    %30 = arith.truncf %29 : vector<30x252xf32> to vector<30x252xbf16>
    %c0_15 = arith.constant 0 : index
    %c0_16 = arith.constant 0 : index
    %31 = vector.load %arg4[%c0_15, %c0_16] : memref<252x192xbf16, #tpu.memory_space<vmem>>, vector<252x192xbf16>
    %cst_17 = arith.constant dense<0.000000e+00> : vector<30x192xf32>
    %32 = tpu.matmul %30, %31, %cst_17 {dimension_numbers = #tpu.dot_dimension_numbers<[1], [0], [0], [1], [0, 0, 1, 1], [], []>} : vector<30x252xbf16>, vector<252x192xbf16>, vector<30x192xf32> -> vector<30x192xf32>
    %c0_18 = arith.constant 0 : index
    %c0_19 = arith.constant 0 : index
    %33 = vector.load %arg5[%c0_18, %c0_19] : memref<1x192xf32, #tpu.memory_space<vmem>>, vector<1x192xf32>
    %34 = vector.broadcast %33 : vector<1x192xf32> to vector<30x192xf32>
    %35 = arith.addf %32, %34 : vector<30x192xf32>
    %cst_20 = arith.constant 0.000000e+00 : f32
    %36 = vector.broadcast %cst_20 : f32 to vector<30x192xf32>
    %37 = arith.maximumf %35, %36 : vector<30x192xf32>
    %38 = vector.extract_strided_slice %37 {offsets = [0, 0], sizes = [29, 192], strides = [1, 1]} : vector<30x192xf32> to vector<29x192xf32>
    %39 = vector.extract_strided_slice %37 {offsets = [1, 0], sizes = [29, 192], strides = [1, 1]} : vector<30x192xf32> to vector<29x192xf32>
    %40 = arith.maximumf %38, %39 : vector<29x192xf32>
    %41 = vector.extract_strided_slice %40 {offsets = [0, 0], sizes = [29, 191], strides = [1, 1]} : vector<29x192xf32> to vector<29x191xf32>
    %42 = vector.extract_strided_slice %40 {offsets = [0, 1], sizes = [29, 191], strides = [1, 1]} : vector<29x192xf32> to vector<29x191xf32>
    %43 = arith.maximumf %41, %42 : vector<29x191xf32>
    %44 = arith.truncf %43 : vector<29x191xf32> to vector<29x191xbf16>
    %c0_21 = arith.constant 0 : index
    %c0_22 = arith.constant 0 : index
    %45 = vector.load %arg7[%c0_21, %c0_22] : memref<191x96xbf16, #tpu.memory_space<vmem>>, vector<191x96xbf16>
    %cst_23 = arith.constant dense<0.000000e+00> : vector<29x96xf32>
    %46 = tpu.matmul %44, %45, %cst_23 {dimension_numbers = #tpu.dot_dimension_numbers<[1], [0], [0], [1], [0, 0, 1, 1], [], []>} : vector<29x191xbf16>, vector<191x96xbf16>, vector<29x96xf32> -> vector<29x96xf32>
    %c0_24 = arith.constant 0 : index
    %c0_25 = arith.constant 0 : index
    %47 = vector.load %arg16[%c0_24, %c0_25] : memref<32x96xf32, #tpu.memory_space<vmem>>, vector<29x96xf32>
    tpu.vector_store %arg16[%c0_24, %c0_25], %46 {strides = array<i32>} : memref<32x96xf32, #tpu.memory_space<vmem>>, vector<29x96xf32>,
    %cst_26 = arith.constant 0.000000e+00 : f32
    %48 = vector.broadcast %cst_26 : f32 to vector<3x96xf32>
    %c29 = arith.constant 29 : index
    %c0_27 = arith.constant 0 : index
    %49 = vector.load %arg16[%c29, %c0_27] : memref<32x96xf32, #tpu.memory_space<vmem>>, vector<3x96xf32>
    tpu.vector_store %arg16[%c29, %c0_27], %48 {strides = array<i32>} : memref<32x96xf32, #tpu.memory_space<vmem>>, vector<3x96xf32>,
    %c0_28 = arith.constant 0 : index
    %c0_29 = arith.constant 0 : index
    %50 = tpu.strided_load %arg16[%c0_28, %c0_29] {strides = array<i32: 16, 1>} : memref<32x96xf32, #tpu.memory_space<vmem>>, vector<2x96xf32>
    %c0_30 = arith.constant 0 : index
    %c0_31 = arith.constant 0 : index
    %51 = vector.load %arg17[%c0_30, %c0_31] : memref<2x576xf32, #tpu.memory_space<vmem>>, vector<2x96xf32>
    tpu.vector_store %arg17[%c0_30, %c0_31], %50 {strides = array<i32>} : memref<2x576xf32, #tpu.memory_space<vmem>>, vector<2x96xf32>,
    %c2 = arith.constant 2 : index
    %c0_32 = arith.constant 0 : index
    %52 = tpu.strided_load %arg16[%c2, %c0_32] {strides = array<i32: 16, 1>} : memref<32x96xf32, #tpu.memory_space<vmem>>, vector<2x96xf32>
    %c0_33 = arith.constant 0 : index
    %c96 = arith.constant 96 : index
    %53 = vector.load %arg17[%c0_33, %c96] : memref<2x576xf32, #tpu.memory_space<vmem>>, vector<2x96xf32>
    tpu.vector_store %arg17[%c0_33, %c96], %52 {strides = array<i32>} : memref<2x576xf32, #tpu.memory_space<vmem>>, vector<2x96xf32>,
    %c4 = arith.constant 4 : index
    %c0_34 = arith.constant 0 : index
    %54 = tpu.strided_load %arg16[%c4, %c0_34] {strides = array<i32: 16, 1>} : memref<32x96xf32, #tpu.memory_space<vmem>>, vector<2x96xf32>
    %c0_35 = arith.constant 0 : index
    %c192 = arith.constant 192 : index
    %55 = vector.load %arg17[%c0_35, %c192] : memref<2x576xf32, #tpu.memory_space<vmem>>, vector<2x96xf32>
    tpu.vector_store %arg17[%c0_35, %c192], %54 {strides = array<i32>} : memref<2x576xf32, #tpu.memory_space<vmem>>, vector<2x96xf32>,
    %c6 = arith.constant 6 : index
    %c0_36 = arith.constant 0 : index
    %56 = tpu.strided_load %arg16[%c6, %c0_36] {strides = array<i32: 16, 1>} : memref<32x96xf32, #tpu.memory_space<vmem>>, vector<2x96xf32>
    %c0_37 = arith.constant 0 : index
    %c288 = arith.constant 288 : index
    %57 = vector.load %arg17[%c0_37, %c288] : memref<2x576xf32, #tpu.memory_space<vmem>>, vector<2x96xf32>
    tpu.vector_store %arg17[%c0_37, %c288], %56 {strides = array<i32>} : memref<2x576xf32, #tpu.memory_space<vmem>>, vector<2x96xf32>,
    %c8 = arith.constant 8 : index
    %c0_38 = arith.constant 0 : index
    %58 = tpu.strided_load %arg16[%c8, %c0_38] {strides = array<i32: 16, 1>} : memref<32x96xf32, #tpu.memory_space<vmem>>, vector<2x96xf32>
    %c0_39 = arith.constant 0 : index
    %c384 = arith.constant 384 : index
    %59 = vector.load %arg17[%c0_39, %c384] : memref<2x576xf32, #tpu.memory_space<vmem>>, vector<2x96xf32>
    tpu.vector_store %arg17[%c0_39, %c384], %58 {strides = array<i32>} : memref<2x576xf32, #tpu.memory_space<vmem>>, vector<2x96xf32>,
    %c10 = arith.constant 10 : index
    %c0_40 = arith.constant 0 : index
    %60 = tpu.strided_load %arg16[%c10, %c0_40] {strides = array<i32: 16, 1>} : memref<32x96xf32, #tpu.memory_space<vmem>>, vector<2x96xf32>
    %c0_41 = arith.constant 0 : index
    %c480 = arith.constant 480 : index
    %61 = vector.load %arg17[%c0_41, %c480] : memref<2x576xf32, #tpu.memory_space<vmem>>, vector<2x96xf32>
    tpu.vector_store %arg17[%c0_41, %c480], %60 {strides = array<i32>} : memref<2x576xf32, #tpu.memory_space<vmem>>, vector<2x96xf32>,
    %c0_42 = arith.constant 0 : index
    %c0_43 = arith.constant 0 : index
    %62 = vector.load %arg17[%c0_42, %c0_43] : memref<2x576xf32, #tpu.memory_space<vmem>>, vector<2x576xf32>
    %63 = arith.truncf %62 : vector<2x576xf32> to vector<2x576xbf16>
    %c0_44 = arith.constant 0 : index
    %c0_45 = arith.constant 0 : index
    %64 = vector.load %arg8[%c0_44, %c0_45] : memref<576x128xbf16, #tpu.memory_space<vmem>>, vector<576x128xbf16>
    %cst_46 = arith.constant dense<0.000000e+00> : vector<2x128xf32>
    %65 = tpu.matmul %63, %64, %cst_46 {dimension_numbers = #tpu.dot_dimension_numbers<[1], [0], [0], [1], [0, 0, 1, 1], [], []>} : vector<2x576xbf16>, vector<576x128xbf16>, vector<2x128xf32> -> vector<2x128xf32>
    %c0_47 = arith.constant 0 : index
    %c0_48 = arith.constant 0 : index
    %66 = vector.load %arg9[%c0_47, %c0_48] : memref<1x128xf32, #tpu.memory_space<vmem>>, vector<1x128xf32>
    %67 = vector.broadcast %66 : vector<1x128xf32> to vector<2x128xf32>
    %68 = arith.addf %65, %67 : vector<2x128xf32>
    %cst_49 = arith.constant 0.000000e+00 : f32
    %69 = vector.broadcast %cst_49 : f32 to vector<2x128xf32>
    %70 = arith.maximumf %68, %69 : vector<2x128xf32>
    %71 = arith.truncf %70 : vector<2x128xf32> to vector<2x128xbf16>
    %c0_50 = arith.constant 0 : index
    %c0_51 = arith.constant 0 : index
    %72 = vector.load %arg10[%c0_50, %c0_51] : memref<128x128xbf16, #tpu.memory_space<vmem>>, vector<128x128xbf16>
    %cst_52 = arith.constant dense<0.000000e+00> : vector<2x128xf32>
    %73 = tpu.matmul %71, %72, %cst_52 {dimension_numbers = #tpu.dot_dimension_numbers<[1], [0], [0], [1], [0, 0, 1, 1], [], []>} : vector<2x128xbf16>, vector<128x128xbf16>, vector<2x128xf32> -> vector<2x128xf32>
    %c0_53 = arith.constant 0 : index
    %c0_54 = arith.constant 0 : index
    %74 = vector.load %arg11[%c0_53, %c0_54] : memref<1x128xf32, #tpu.memory_space<vmem>>, vector<1x128xf32>
    %75 = vector.broadcast %74 : vector<1x128xf32> to vector<2x128xf32>
    %76 = arith.addf %73, %75 : vector<2x128xf32>
    %cst_55 = arith.constant 0.000000e+00 : f32
    %77 = vector.broadcast %cst_55 : f32 to vector<2x128xf32>
    %78 = arith.maximumf %76, %77 : vector<2x128xf32>
    %79 = arith.truncf %78 : vector<2x128xf32> to vector<2x128xbf16>
    %c0_56 = arith.constant 0 : index
    %c0_57 = arith.constant 0 : index
    %80 = vector.load %arg12[%c0_56, %c0_57] : memref<128x10xbf16, #tpu.memory_space<vmem>>, vector<128x10xbf16>
    %cst_58 = arith.constant dense<0.000000e+00> : vector<2x10xf32>
    %81 = tpu.matmul %79, %80, %cst_58 {dimension_numbers = #tpu.dot_dimension_numbers<[1], [0], [0], [1], [0, 0, 1, 1], [], []>} : vector<2x128xbf16>, vector<128x10xbf16>, vector<2x10xf32> -> vector<2x10xf32>
    %c0_59 = arith.constant 0 : index
    %c0_60 = arith.constant 0 : index
    %82 = vector.load %arg13[%c0_59, %c0_60] : memref<1x10xf32, #tpu.memory_space<vmem>>, vector<1x10xf32>
    %83 = vector.broadcast %82 : vector<1x10xf32> to vector<2x10xf32>
    %84 = arith.addf %81, %83 : vector<2x10xf32>
    %c0_61 = arith.constant 0 : index
    %c0_62 = arith.constant 0 : index
    %85 = vector.load %arg14[%c0_61, %c0_62] : memref<2x10xf32, #tpu.memory_space<vmem>>, vector<2x10xf32>
    tpu.vector_store %arg14[%c0_61, %c0_62], %84 {strides = array<i32>} : memref<2x10xf32, #tpu.memory_space<vmem>>, vector<2x10xf32>,
    return
  }
  func.func @transform_0(%arg0: i32) -> (i32, i32) {
    %c0_i32 = arith.constant 0 : i32
    %c0_i32_0 = arith.constant 0 : i32
    return %arg0, %c0_i32 : i32, i32
  }
  func.func @transform_1(%arg0: i32) -> (i32, i32) {
    %c0_i32 = arith.constant 0 : i32
    %c0_i32_0 = arith.constant 0 : i32
    %c0_i32_1 = arith.constant 0 : i32
    return %c0_i32, %c0_i32_0 : i32, i32
  }
  func.func @transform_2(%arg0: i32) -> (i32, i32) {
    %c0_i32 = arith.constant 0 : i32
    %c0_i32_0 = arith.constant 0 : i32
    %c0_i32_1 = arith.constant 0 : i32
    return %c0_i32, %c0_i32_0 : i32, i32
  }
  func.func @transform_3(%arg0: i32) -> (i32, i32) {
    %c0_i32 = arith.constant 0 : i32
    %c0_i32_0 = arith.constant 0 : i32
    %c0_i32_1 = arith.constant 0 : i32
    return %c0_i32, %c0_i32_0 : i32, i32
  }
  func.func @transform_4(%arg0: i32) -> (i32, i32) {
    %c0_i32 = arith.constant 0 : i32
    %c0_i32_0 = arith.constant 0 : i32
    %c0_i32_1 = arith.constant 0 : i32
    return %c0_i32, %c0_i32_0 : i32, i32
  }
  func.func @transform_5(%arg0: i32) -> (i32, i32) {
    %c0_i32 = arith.constant 0 : i32
    %c0_i32_0 = arith.constant 0 : i32
    %c0_i32_1 = arith.constant 0 : i32
    return %c0_i32, %c0_i32_0 : i32, i32
  }
  func.func @transform_6(%arg0: i32) -> (i32, i32) {
    %c0_i32 = arith.constant 0 : i32
    %c0_i32_0 = arith.constant 0 : i32
    %c0_i32_1 = arith.constant 0 : i32
    return %c0_i32, %c0_i32_0 : i32, i32
  }
  func.func @transform_7(%arg0: i32) -> (i32, i32) {
    %c0_i32 = arith.constant 0 : i32
    %c0_i32_0 = arith.constant 0 : i32
    %c0_i32_1 = arith.constant 0 : i32
    return %c0_i32, %c0_i32_0 : i32, i32
  }
  func.func @transform_8(%arg0: i32) -> (i32, i32) {
    %c0_i32 = arith.constant 0 : i32
    %c0_i32_0 = arith.constant 0 : i32
    %c0_i32_1 = arith.constant 0 : i32
    return %c0_i32, %c0_i32_0 : i32, i32
  }
  func.func @transform_9(%arg0: i32) -> (i32, i32) {
    %c0_i32 = arith.constant 0 : i32
    %c0_i32_0 = arith.constant 0 : i32
    %c0_i32_1 = arith.constant 0 : i32
    return %c0_i32, %c0_i32_0 : i32, i32
  }
  func.func @transform_10(%arg0: i32) -> (i32, i32) {
    %c0_i32 = arith.constant 0 : i32
    %c0_i32_0 = arith.constant 0 : i32
    %c0_i32_1 = arith.constant 0 : i32
    return %c0_i32, %c0_i32_0 : i32, i32
  }
  func.func @transform_11(%arg0: i32) -> (i32, i32) {
    %c0_i32 = arith.constant 0 : i32
    %c0_i32_0 = arith.constant 0 : i32
    %c0_i32_1 = arith.constant 0 : i32
    return %c0_i32, %c0_i32_0 : i32, i32
  }
  func.func @transform_12(%arg0: i32) -> (i32, i32) {
    %c0_i32 = arith.constant 0 : i32
    %c0_i32_0 = arith.constant 0 : i32
    %c0_i32_1 = arith.constant 0 : i32
    return %c0_i32, %c0_i32_0 : i32, i32
  }
  func.func @transform_13(%arg0: i32) -> (i32, i32) {
    %c0_i32 = arith.constant 0 : i32
    %c0_i32_0 = arith.constant 0 : i32
    return %arg0, %c0_i32 : i32, i32
  }
}

</mosaic_0001>

<bundles_post_ra>
// kernel: net_forward.1
= control target key start
LH: loop header
LB: loop body
LE: loop exit
PB: predicated region body
PF: predicated region fallthrough
CT: control target
= control target key end

     0   :  { %vm62_vm0 = vcmask 1046528   ;;  %vm102_vm1 = vcmask 1045504   ;;  %s2661_s26 = smov 30   ;;  %vm253_vm2 = vcmask 1044480   ;;  %s3568_s0 = inlined_call_operand.vmem [shape: f32[64,30], index: 0, kind: input, shape index: {}]   ;;  %s3569_s1 = inlined_call_operand.vmem [shape: bf16[90,168], index: 1, kind: input, shape index: {}]   ;;  %s3570_s2 = inlined_call_operand.vmem [shape: f32[1,168], index: 2, kind: input, shape index: {}]   ;;  %s3571_s3 = inlined_call_operand.vmem [shape: bf16[252,192], index: 3, kind: input, shape index: {}]   ;;  %s3572_s4 = inlined_call_operand.vmem [shape: f32[1,192], index: 4, kind: input, shape index: {}]   ;;  %s3573_s5 = inlined_call_operand.vmem [shape: bf16[167,84], index: 5, kind: input, shape index: {}]   ;;  %s3574_s6 = inlined_call_operand.vmem [shape: bf16[191,96], index: 6, kind: input, shape index: {}]   ;;  %s3575_s7 = inlined_call_operand.vmem [shape: bf16[576,128], index: 7, kind: input, shape index: {}]   ;;  %s3576_s8 = inlined_call_operand.vmem [shape: f32[1,128], index: 8, kind: input, shape index: {}]   ;;  %s3577_s9 = inlined_call_operand.vmem [shape: bf16[128,128], index: 9, kind: input, shape index: {}]   ;;  %s3578_s10 = inlined_call_operand.vmem [shape: f32[1,128], index: 10, kind: input, shape index: {}]   ;;  %s3579_s11 = inlined_call_operand.vmem [shape: bf16[128,10], index: 11, kind: input, shape index: {}]   ;;  %s3580_s12 = inlined_call_operand.vmem [shape: f32[1,10], index: 12, kind: input, shape index: {}]   ;;  %s3581_s13 = inlined_call_operand.hbm [shape: f32[2,10], index: 13, kind: output, shape index: {}]  }
   0x1   :  { %v2745_v0 = vld [vmem:[%s3568_s0] sm:$0xff]  ;;  %v2750_v1 = vld [vmem:[%s3568_s0 + $0x8] sm:$0xff]  ;;  %v2755_v2 = vld [vmem:[%s3568_s0 + $0x10] sm:$0xff] }
   0x2   :  { %v63_v3 = vrot.slane %v2745_v0, 1  ;;  %v64_v4 = vrot.slane %v2750_v1, 1  ;;  %v66_v5 = vrot.slane %v2755_v2, 1  ;;  %v2763_v6 = vld [vmem:[%s3568_s0 + $0x18] sm:$0xff]  ;;  %v103_v7 = vrot.slane %v2745_v0, 2  ;;  %v2770_v9 = vld [vmem:[%s3568_s0 + $0x20] sm:$0xff] }
   0x3   :  { %v104_v8 = vrot.slane %v2750_v1, 2  ;;  %v68_v10 = vrot.slane %v2763_v6, 1  ;;  %v106_v13 = vrot.slane %v2755_v2, 2  ;;  %v70_v14 = vrot.slane %v2770_v9, 1  ;;  %v2780_v15 = vld [vmem:[%s3568_s0 + $0x28] sm:$0xff]  ;;  %v2785_v16 = vld [vmem:[%s3568_s0 + $0x30] sm:$0xff] }
   0x4   :  { %v65_v11 = vsel %vm62_vm0, %v63_v3, %v64_v4  ;;  %v67_v12 = vsel %vm62_vm0, %v64_v4, %v66_v5  ;;  %v108_v20 = vrot.slane %v2763_v6, 2  ;;  %v110_v21 = vrot.slane %v2770_v9, 2  ;;  %v1934_v22 = vld [vmem:[%s3569_s1 + $0x50] sm:$0xf]  ;;  %v2394_v23 = vld [vmem:[%s3569_s1 + $0x54] sm:$0x10] }
   0x5   :  { %v2512_v17 = vpack.i.bf16 %v67_v12, %v65_v11  ;;  %v69_v18 = vsel %vm62_vm0, %v66_v5, %v68_v10  ;;  %v71_v19 = vsel %vm62_vm0, %v68_v10, %v70_v14  ;;  %v72_v25 = vrot.slane %v2780_v15, 1  ;;  %v2393_v31 = vld [vmem:[%s3569_s1 + $0x54] sm:$0xf]  ;;  %v1936_v32 = vld [vmem:[%s3569_s1 + $0x58] sm:$0x10] }
   0x6   :  { %v2522_v24 = vpack.i.bf16 %v71_v19, %v69_v18  ;;  %v74_v26 = vrot.slane %v2785_v16, 1  ;;  %v105_v27 = vsel %vm102_vm1, %v103_v7, %v104_v8  ;;  %v107_v28 = vsel %vm102_vm1, %v104_v8, %v106_v13  ;;  %v2816_v35 = vld [vmem:[%s3568_s0 + $0x38] sm:$0xff]  ;;  %v1926_v37 = vld [vmem:[%s3569_s1 + $0x40] sm:$0xf]  ;;  %v2392_v38 = vld [vmem:[%s3569_s1 + $0x44] sm:$0xf0] }
   0x7   :  { %2513 = vrot.lane.b32.xlu0 %v2512_v17, %s2661_s26  ;;  %v114_v29 = vrot.slane %v2785_v16, 2  ;;  %v112_v30 = vrot.slane %v2780_v15, 2  ;;  %v73_v33 = vsel %vm62_vm0, %v70_v14, %v72_v25  ;;  %v1935_v36 = vor.u32 %v2394_v23, %v1934_v22 }
   0x8   :  { %2523 = vrot.lane.b32.xlu1 %v2522_v24, %s2661_s26  ;;  %v75_v34 = vsel %vm62_vm0, %v72_v25, %v74_v26  ;;  %v109_v39 = vsel %vm102_vm1, %v106_v13, %v108_v20  ;;  %v111_v40 = vsel %vm102_vm1, %v108_v20, %v110_v21  ;;  %v2517_v42 = vpack.i.bf16 %v107_v28, %v105_v27 }
   0x9   :  { %v2532_v41 = vpack.i.bf16 %v75_v34, %v73_v33  ;;  %v255_v43 = vsel %vm253_vm2, %v1935_v36, 0 }
   0xa   :  { %18 = vsyncpa [#allocation6], 0  ;;  %v76_v44 = vrot.slane %v2816_v35, 1  ;;  %262 = vmatpush.bf16.msra.mxu0 %v255_v43  ;;  %v1939_v45 = vor.u32 %v2393_v31, %v1936_v32  ;;  %v1927_v46 = vor.u32 %v2392_v38, %v1926_v37  ;;  %v2391_v47 = vld [vmem:[%s3569_s1 + $0x44] sm:$0xf]  ;;  %v2527_v49 = vpack.i.bf16 %v111_v40, %v109_v39  ;;  %s2662_s28 = smov 60  }
   0xb   :  { %2533 = vrot.lane.b32.xlu2 %v2532_v41, %s2661_s26  ;;  %v1928_v48 = vld [vmem:[%s3569_s1 + $0x48] sm:$0xf0]  ;;  %v113_v50 = vsel %vm102_vm1, %v110_v21, %v112_v30  ;;  %v115_v51 = vsel %vm102_vm1, %v112_v30, %v114_v29  ;;  %v1918_v52 = vld [vmem:[%s3569_s1 + $0x30] sm:$0xf]  ;;  %v2390_v53 = vld [vmem:[%s3569_s1 + $0x34] sm:$0xf0] }
   0xc   :  { %v116_v54 = vrot.slane %v2816_v35, 2  ;;  %v258_v55 = vsel %vm253_vm2, %v1939_v45, 0  ;;  %v1931_v56 = vor.u32 %v2391_v47, %v1928_v48  ;;  %v77_v57 = vsel %vm62_vm0, %v74_v26, %v76_v44  ;;  %v2389_v60 = vld [vmem:[%s3569_s1 + $0x34] sm:$0xf]  ;;  %v1920_v61 = vld [vmem:[%s3569_s1 + $0x38] sm:$0xf0] }
   0xd   :  { %291 = vmatpush.bf16.msra.mxu1 %v258_v55  ;;  %v2537_v58 = vpack.i.bf16 %v115_v51, %v113_v50  ;;  %v1919_v59 = vor.u32 %v2390_v53, %v1918_v52  ;;  %v2542_v63 = vpack.i.bf16 %v76_v44, %v77_v57  ;;  %v1923_v3 = vor.u32 %v2389_v60, %v1920_v61  ;;  %v1910_v5 = vld [vmem:[%s3569_s1 + $0x20] sm:$0xf]  ;;  %v2388_v7 = vld [vmem:[%s3569_s1 + $0x24] sm:$0xf0]  ;;  %v2387_v8 = vld [vmem:[%s3569_s1 + $0x24] sm:$0xf] }
   0xe   :  { %263 = vmatpush.bf16.msra.mxu0 %v1927_v46  ;;  %v117_v62 = vsel %vm102_vm1, %v114_v29, %v116_v54  ;;  %v1911_v10 = vor.u32 %v2388_v7, %v1910_v5  ;;  %v1912_v11 = vld [vmem:[%s3569_s1 + $0x28] sm:$0xf0]  ;;  %v1902_v13 = vld [vmem:[%s3569_s1 + $0x10] sm:$0xf]  ;;  %v2386_v14 = vld [vmem:[%s3569_s1 + $0x14] sm:$0xf0] }
   0xf   :  { %2518 = vrot.lane.b32.xlu0 %v2517_v42, %s2662_s28  ;;  %v2547_v4 = vpack.i.bf16 %v116_v54, %v117_v62  ;;  %v1915_v12 = vor.u32 %v2387_v8, %v1912_v11  ;;  %v2385_v17 = vld [vmem:[%s3569_s1 + $0x14] sm:$0xf]  ;;  %v1903_v18 = vor.u32 %v2386_v14, %v1902_v13  ;;  %v1904_v19 = vld [vmem:[%s3569_s1 + $0x18] sm:$0xf0]  ;;  %v1894_v21 = vld [vmem:[%s3569_s1] sm:$0xf] }
  0x10   :  { %2528 = vrot.lane.b32.xlu1 %v2527_v49, %s2662_s28  ;;  %v1907_v20 = vor.u32 %v2385_v17, %v1904_v19  ;;  %v2384_v22 = vld [vmem:[%s3569_s1 + $0x4] sm:$0xf0]  ;;  %v2383_v23 = vld [vmem:[%s3569_s1 + $0x4] sm:$0xf]  ;;  %v1896_v25 = vld [vmem:[%s3569_s1 + $0x8] sm:$0xf0] }
  0x11   :  { %292 = vmatpush.bf16.msra.mxu1 %v1931_v56  ;;  %v1895_v24 = vor.u32 %v2384_v22, %v1894_v21  ;;  %v1899_v26 = vor.u32 %v2383_v23, %v1896_v25  ;;  %vm142_vm3 = vcmask 244736   ;;  %vm151_vm4 = vcmask 490496   ;;  %v176_v5 = vld [vmem:[%s3570_s2] sm:$0x3]  ;;  %s2663_s2 = smov 127   ;;  %s2666_s19 = smov 40  }
  0x12   :  { %264 = vmatpush.bf16.msra.mxu0 %v1919_v59  ;;  %vm240_vm5 = vcmask 736256   ;;  %vm606_vm6 = vcmask 1042432   ;;  %vm607_vm7 = vcmask 1043456   ;;  %vm460_vm8 = vcmask 1039360   ;;  %s2667_s0 = smov 84   ;;  %s2671_s25 = smov [#allocation5]  }
  0x13   :  { %2538 = vrot.lane.b32.xlu2 %v2537_v58, %s2662_s28  ;;  %vm593_vm9 = vcmask 318464   ;;  %vm671_vm10 = vcmask 687104   ;;  %vm681_vm11 = vcmask 681984   ;;  %vm679_vm12 = vcmask 684032   ;;  %s1881_s27 = sshll.u32 %s2671_s25, 4  ;;  %s1882_s27 = int_to_ptr.vmem [resolvable:$true] %s1881_s27 }
  0x14   :  { %vm1226_vm13 = vcmask 1047552   ;;  %vm736_vm14 = vcmask 326656   ;;  %vm941_vm15 = vcmask 1014784   ;;  %vm1274_vm2 = vcmask 782336  }
  0x15   :  { %293 = vmatpush.bf16.msra.mxu1 %v1923_v3 }
  0x16   :  { %265 = vmatpush.bf16.msra.mxu0 %v1911_v10  ;;  %v2925_v10 = vperm.slane %v176_v5, 0 }
  0x17   :  { %2543 = vrot.lane.b32.xlu0 %v2542_v63, %s2661_s26 }
  0x18   :  { %2548 = vrot.lane.b32.xlu1 %v2547_v4, %s2662_s28 }
  0x19   :  { %294 = vmatpush.bf16.msra.mxu1 %v1915_v12 }
  0x1a   :  { %266 = vmatpush.bf16.msra.mxu0 %v1903_v18 }
  0x1d   :  { %295 = vmatpush.bf16.msra.mxu1 %v1907_v20 }
  0x1e   :  { %267 = vmatpush.bf16.msra.mxu0 %v1895_v24 }
  0x21   :  { %296 = vmatpush.bf16.msra.mxu1 %v1899_v26 }
  0x65   :  { %v2534_v45 = vpop.permute.xlu2 %2533 }
  0x66   :  { %v2536_v49 = vunpack.i.h.bf16 %v2534_v45  ;;  %v2535_v50 = vunpack.i.l.bf16 %v2534_v45 }
  0x6d   :  { %v2539_v51 = vpop.permute.xlu2 %2538 }
  0x6e   :  { %v2541_v52 = vunpack.i.h.bf16 %v2539_v51  ;;  %v2540_v53 = vunpack.i.l.bf16 %v2539_v51 }
  0x79   :  { %v2514_v27 = vpop.permute.xlu0 %2513 }
  0x7a   :  { %v2516_v28 = vunpack.i.h.bf16 %v2514_v27  ;;  %v2515_v29 = vunpack.i.l.bf16 %v2514_v27  ;;  %v2524_v31 = vpop.permute.xlu1 %2523 }
  0x7b   :  { %v2526_v40 = vunpack.i.h.bf16 %v2524_v31  ;;  %v2525_v41 = vunpack.i.l.bf16 %v2524_v31 }
  0x7c   :  { %v144_v34 = vsel %vm142_vm3, %v2750_v1, %v2516_v28  ;;  %v143_v36 = vsel %vm142_vm3, %v2745_v0, %v2515_v29 }
  0x7d   :  { %v146_v1 = vsel %vm142_vm3, %v2763_v6, %v2526_v40  ;;  %v145_v0 = vsel %vm142_vm3, %v2755_v2, %v2525_v41  ;;  %v148_v6 = vsel %vm142_vm3, %v2780_v15, %v2536_v49  ;;  %v147_v2 = vsel %vm142_vm3, %v2770_v9, %v2535_v50 }
  0x7e   :  { %v156_v54 = vsel %vm151_vm4, %v147_v2, %v2540_v53  ;;  %v157_v55 = vsel %vm151_vm4, %v148_v6, %v2541_v52 }
  0x7f   :  { %v162_v56 = vpack.c.bf16 %v157_v55, %v156_v54 }
  0x81   :  { %v2519_v30 = vpop.permute.xlu0 %2518 }
  0x82   :  { %v2521_v32 = vunpack.i.h.bf16 %v2519_v30  ;;  %v2520_v33 = vunpack.i.l.bf16 %v2519_v30  ;;  %v2529_v42 = vpop.permute.xlu1 %2528 }
  0x83   :  { %v2531_v43 = vunpack.i.h.bf16 %v2529_v42  ;;  %v2530_v44 = vunpack.i.l.bf16 %v2529_v42 }
  0x84   :  { %v152_v37 = vsel %vm151_vm4, %v143_v36, %v2520_v33  ;;  %v153_v38 = vsel %vm151_vm4, %v144_v34, %v2521_v32 }
  0x85   :  { %v160_v39 = vpack.c.bf16 %v153_v38, %v152_v37  ;;  %v154_v46 = vsel %vm151_vm4, %v145_v0, %v2530_v44  ;;  %v155_v47 = vsel %vm151_vm4, %v146_v1, %v2531_v43 }
  0x86   :  { %v161_v48 = vpack.c.bf16 %v155_v47, %v154_v46 }
  0x87   :  { %1940 = vmatmul.msk.bf16.vlgmr.msra.gmra.mxu0 %vm240_vm5, %v160_v39  ;;  %1944 = vmatmul.msk.bf16.vlgmr.msra.gmra.mxu1 %vm240_vm5, %v160_v39 }
  0x89   :  { %v2544_v57 = vpop.permute.xlu0 %2543 }
  0x8a   :  { %v2546_v58 = vunpack.i.h.bf16 %v2544_v57  ;;  %v2545_v59 = vunpack.i.l.bf16 %v2544_v57  ;;  %v2549_v60 = vpop.permute.xlu1 %2548 }
  0x8b   :  { %v2551_v61 = vunpack.i.h.bf16 %v2549_v60  ;;  %v2550_v62 = vunpack.i.l.bf16 %v2549_v60 }
  0x8c   :  { %v150_v15 = vsel %vm142_vm3, %v2816_v35, %v2546_v58  ;;  %v149_v9 = vsel %vm142_vm3, %v2785_v16, %v2545_v59  ;;  %v2927_v35 = vperm.slane %v176_v5, 1  ;;  %vm1279_vm3 = vcmask 779264  }
  0x8d   :  { %v158_v63 = vsel %vm151_vm4, %v149_v9, %v2550_v62  ;;  %v159_v3 = vsel %vm151_vm4, %v150_v15, %v2551_v61  ;;  %vm1289_vm4 = vcmask 1042176  }
  0x8e   :  { %v163_v4 = vpack.c.bf16 %v159_v3, %v158_v63 }
  0x97   :  { %1941 = vmatmul.msk.bf16.gmra.mxu0 %vm240_vm5, %v161_v48  ;;  %1945 = vmatmul.msk.bf16.gmra.mxu1 %vm240_vm5, %v161_v48 }
  0xa7   :  { %1942 = vmatmul.msk.bf16.gmra.mxu0 %vm240_vm5, %v162_v56  ;;  %1946 = vmatmul.msk.bf16.gmra.mxu1 %vm240_vm5, %v162_v56 }
  0xb7   :  { %1943 = vmatmul.msk.bf16.gmra.mxu0 %vm240_vm5, %v163_v4  ;;  %1947 = vmatmul.msk.bf16.gmra.mxu1 %vm240_vm5, %v163_v4  ;;  %vm1290_vm5 = vcmask 519170  }
 0x104   :  { %v269_v7 = vpop.f32.mrf.mxu0  ;;  %v298_v8 = vpop.f32.mrf.mxu1 }
 0x105   :  { %v270_v16 = vadd.f32 %v269_v7, %v2925_v10  ;;  %v299_v11 = vadd.f32 %v298_v8, %v2927_v35 }
 0x107   :  { %v318_v14 = vmax.f32 %v270_v16, 0.0  ;;  %v319_v17 = vmax.f32 %v299_v11, 0.0 }
 0x109   :  { %v350_v22 = vrot.slane %v318_v14, 1  ;;  %v353_v23 = vrot.slane %v319_v17, 1 }
 0x10c   :  { %v271_v12 = vpop.f32.mrf.mxu0  ;;  %v300_v13 = vpop.f32.mrf.mxu1 }
 0x10d   :  { %v272_v18 = vadd.f32 %v271_v12, %v2925_v10  ;;  %v301_v19 = vadd.f32 %v300_v13, %v2927_v35 }
 0x10f   :  { %v320_v20 = vmax.f32 %v272_v18, 0.0  ;;  %v321_v21 = vmax.f32 %v301_v19, 0.0 }
 0x111   :  { %v351_v24 = vrot.slane %v320_v20, 1  ;;  %v354_v25 = vrot.slane %v321_v21, 1 }
 0x113   :  { %v352_v26 = vsel %vm62_vm0, %v350_v22, %v351_v24  ;;  %v355_v27 = vsel %vm62_vm0, %v353_v23, %v354_v25 }
 0x114   :  { %v274_v28 = vpop.f32.mrf.mxu0  ;;  %v303_v29 = vpop.f32.mrf.mxu1  ;;  %v2935_v30 = vmax.f32 %v318_v14, %v352_v26  ;;  %v2937_v31 = vmax.f32 %v319_v17, %v355_v27 }
 0x115   :  { %v275_v32 = vadd.f32 %v274_v28, %v2925_v10  ;;  %v304_v33 = vadd.f32 %v303_v29, %v2927_v35 }
 0x116   :  { %v2552_v34 = vpack.i.bf16 %v2937_v31, %v2935_v30 }
 0x117   :  { %v322_v36 = vmax.f32 %v275_v32, 0.0  ;;  %v323_v37 = vmax.f32 %v304_v33, 0.0 }
 0x118   :  { %2553 = vrot.lane.b32.xlu2 %v2552_v34, %s2663_s2 }
 0x119   :  { %v356_v38 = vrot.slane %v322_v36, 1  ;;  %v358_v39 = vrot.slane %v323_v37, 1 }
 0x11b   :  { %v357_v40 = vsel %vm62_vm0, %v351_v24, %v356_v38  ;;  %v359_v41 = vsel %vm62_vm0, %v354_v25, %v358_v39 }
 0x11c   :  { %v276_v42 = vpop.f32.mrf.mxu0  ;;  %v305_v43 = vpop.f32.mrf.mxu1  ;;  %v2946_v44 = vmax.f32 %v320_v20, %v357_v40  ;;  %v2948_v1 = vmax.f32 %v321_v21, %v359_v41 }
 0x11d   :  { %v277_v0 = vadd.f32 %v276_v42, %v2925_v10  ;;  %v306_v45 = vadd.f32 %v305_v43, %v2927_v35 }
 0x11e   :  { %v2557_v46 = vpack.i.bf16 %v2948_v1, %v2946_v44 }
 0x11f   :  { %v324_v47 = vmax.f32 %v277_v0, 0.0  ;;  %v325_v48 = vmax.f32 %v306_v45, 0.0 }
 0x120   :  { %2558 = vrot.lane.b32.xlu0 %v2557_v46, %s2663_s2 }
 0x121   :  { %v360_v49 = vrot.slane %v324_v47, 1  ;;  %v362_v50 = vrot.slane %v325_v48, 1 }
 0x123   :  { %v361_v51 = vsel %vm62_vm0, %v356_v38, %v360_v49  ;;  %v363_v52 = vsel %vm62_vm0, %v358_v39, %v362_v50 }
 0x124   :  { %v279_v53 = vpop.f32.mrf.mxu0  ;;  %v308_v6 = vpop.f32.mrf.mxu1  ;;  %v2957_v2 = vmax.f32 %v322_v36, %v361_v51  ;;  %v2959_v54 = vmax.f32 %v323_v37, %v363_v52  ;;  %v2402_v51 = vld [vmem:[%s3573_s5 + $0x38] sm:$0xff]  ;;  %v2401_v52 = vld [vmem:[%s3573_s5 + $0x30] sm:$0xff] }
 0x125   :  { %v280_v55 = vadd.f32 %v279_v53, %v2925_v10  ;;  %v309_v56 = vadd.f32 %v308_v6, %v2927_v35  ;;  %613 = vmatpush.bf16.msra.mxu2 %v2402_v51  ;;  %v2400_v53 = vld [vmem:[%s3573_s5 + $0x28] sm:$0xff]  ;;  %v2399_v6 = vld [vmem:[%s3573_s5 + $0x20] sm:$0xff] }
 0x126   :  { %v2562_v57 = vpack.i.bf16 %v2959_v54, %v2957_v2 }
 0x127   :  { %v326_v58 = vmax.f32 %v280_v55, 0.0  ;;  %v327_v59 = vmax.f32 %v309_v56, 0.0  ;;  %v529_v55 = vld [vmem:[%s3573_s5 + $0x50] sm:$0xf] }
 0x128   :  { %2563 = vrot.lane.b32.xlu1 %v2562_v57, %s2663_s2  ;;  %v571_v56 = vunpack.c.l.b16 %v529_v55  ;;  %v2398_v57 = vld [vmem:[%s3573_s5 + $0x18] sm:$0xff] }
 0x129   :  { %v364_v60 = vrot.slane %v326_v58, 1  ;;  %v366_v61 = vrot.slane %v327_v59, 1  ;;  %614 = vmatpush.bf16.msra.mxu2 %v2401_v52 }
 0x12b   :  { %v365_v62 = vsel %vm62_vm0, %v360_v49, %v364_v60  ;;  %v367_v15 = vsel %vm62_vm0, %v362_v50, %v366_v61 }
 0x12c   :  { %v281_v9 = vpop.f32.mrf.mxu0  ;;  %v310_v63 = vpop.f32.mrf.mxu1  ;;  %v2968_v3 = vmax.f32 %v324_v47, %v365_v62  ;;  %v2970_v4 = vmax.f32 %v325_v48, %v367_v15  ;;  %v2397_v15 = vld [vmem:[%s3573_s5 + $0x10] sm:$0xff] }
 0x12d   :  { %v282_v5 = vadd.f32 %v281_v9, %v2925_v10  ;;  %v311_v7 = vadd.f32 %v310_v63, %v2927_v35  ;;  %615 = vmatpush.bf16.msra.mxu2 %v2400_v53  ;;  %v2404_v9 = vld [vmem:[%s3573_s5 + $0x48] sm:$0xff] }
 0x12e   :  { %v2567_v8 = vpack.i.bf16 %v2970_v4, %v2968_v3  ;;  %v2396_v63 = vld [vmem:[%s3573_s5 + $0x8] sm:$0xff] }
 0x12f   :  { %v328_v16 = vmax.f32 %v282_v5, 0.0  ;;  %v329_v11 = vmax.f32 %v311_v7, 0.0  ;;  %v2403_v5 = vld [vmem:[%s3573_s5 + $0x40] sm:$0xff] }
 0x130   :  { %2568 = vrot.lane.b32.xlu2 %v2567_v8, %s2663_s2  ;;  %v2395_v7 = vld [vmem:[%s3573_s5] sm:$0xff] }
 0x131   :  { %v368_v12 = vrot.slane %v328_v16, 1  ;;  %v370_v13 = vrot.slane %v329_v11, 1  ;;  %616 = vmatpush.bf16.msra.mxu2 %v2399_v6 }
 0x133   :  { %v369_v14 = vsel %vm62_vm0, %v364_v60, %v368_v12  ;;  %v371_v17 = vsel %vm62_vm0, %v366_v61, %v370_v13 }
 0x134   :  { %v284_v18 = vpop.f32.mrf.mxu0  ;;  %v313_v19 = vpop.f32.mrf.mxu1  ;;  %v2979_v20 = vmax.f32 %v326_v58, %v369_v14  ;;  %v2981_v21 = vmax.f32 %v327_v59, %v371_v17  ;;  %v582_v58 = vpack.c.b16 %v571_v56, %v571_v56  ;;  %v2664_v59 = vmov 65535  }
 0x135   :  { %v285_v22 = vadd.f32 %v284_v18, %v2925_v10  ;;  %v314_v23 = vadd.f32 %v313_v19, %v2927_v35  ;;  %v608_v60 = vsel %vm606_vm6, 4294967295, %v2664_v59  ;;  %617 = vmatpush.bf16.msra.mxu2 %v2398_v57  ;;  %vm3457_vm6 = vmor %vm1290_vm5, %vm1289_vm4 }
 0x136   :  { %v2572_v24 = vpack.i.bf16 %v2981_v21, %v2979_v20  ;;  %v609_v61 = vsel %vm607_vm7, %v608_v60, 0  ;;  %vm1302_vm7 = vcmask 1041920  }
 0x137   :  { %v330_v25 = vmax.f32 %v285_v22, 0.0  ;;  %v331_v26 = vmax.f32 %v314_v23, 0.0  ;;  %v611_v62 = vand.u32 %v609_v61, %v582_v58 }
 0x138   :  { %2573 = vrot.lane.b32.xlu0 %v2572_v24, %s2663_s2 }
 0x139   :  { %v372_v27 = vrot.slane %v330_v25, 1  ;;  %v374_v28 = vrot.slane %v331_v26, 1  ;;  %647 = vmatpush.bf16.msra.mxu3 %v611_v62  ;;  %618 = vmatpush.bf16.msra.mxu2 %v2397_v15 }
 0x13b   :  { %v373_v29 = vsel %vm62_vm0, %v368_v12, %v372_v27  ;;  %v375_v32 = vsel %vm62_vm0, %v370_v13, %v374_v28 }
 0x13c   :  { %v286_v33 = vpop.f32.mrf.mxu0  ;;  %v315_v34 = vpop.f32.mrf.mxu1  ;;  %v2990_v36 = vmax.f32 %v328_v16, %v373_v29  ;;  %v2992_v37 = vmax.f32 %v329_v11, %v375_v32 }
 0x13d   :  { %v287_v38 = vadd.f32 %v286_v33, %v2925_v10  ;;  %v316_v39 = vadd.f32 %v315_v34, %v2927_v35  ;;  %648 = vmatpush.bf16.msra.mxu3 %v2404_v9  ;;  %619 = vmatpush.bf16.msra.mxu2 %v2396_v63 }
 0x13e   :  { %v2577_v40 = vpack.i.bf16 %v2992_v37, %v2990_v36 }
 0x13f   :  { %v332_v41 = vmax.f32 %v287_v38, 0.0  ;;  %v333_v42 = vmax.f32 %v316_v39, 0.0 }
 0x140   :  { %2578 = vrot.lane.b32.xlu1 %v2577_v40, %s2663_s2 }
 0x141   :  { %v376_v43 = vrot.slane %v332_v41, 1  ;;  %v378_v0 = vrot.slane %v333_v42, 1  ;;  %649 = vmatpush.bf16.msra.mxu3 %v2403_v5  ;;  %620 = vmatpush.bf16.msra.mxu2 %v2395_v7 }
 0x143   :  { %v2999_v45 = vmax.f32 %v332_v41, %v376_v43  ;;  %v3001_v46 = vmax.f32 %v333_v42, %v378_v0  ;;  %v377_v47 = vsel %vm62_vm0, %v372_v27, %v376_v43  ;;  %v379_v48 = vsel %vm62_vm0, %v374_v28, %v378_v0 }
 0x144   :  { %v3005_v10 = vmax.f32 %v330_v25, %v377_v47  ;;  %v3007_v35 = vmax.f32 %v331_v26, %v379_v48 }
 0x145   :  { %v2587_v49 = vpack.i.bf16 %v3001_v46, %v2999_v45 }
 0x146   :  { %v2582_v50 = vpack.i.bf16 %v3007_v35, %v3005_v10 }
 0x147   :  { %2588 = vrot.lane.b32.xlu0 %v2587_v49, %s2663_s2 }
 0x148   :  { %2583 = vrot.lane.b32.xlu2 %v2582_v50, %s2663_s2 }
 0x172   :  { %v2554_v8 = vpop.permute.xlu2 %2553 }
 0x173   :  { %v2556_v16 = vunpack.i.h.bf16 %v2554_v8  ;;  %v2555_v11 = vunpack.i.l.bf16 %v2554_v8 }
 0x175   :  { %v461_v17 = vsel %vm460_vm8, %v2555_v11, %v2556_v16  ;;  %v486_v18 = vmax.f32 %v2937_v31, %v2556_v16 }
 0x176   :  { %v485_v23 = vmax.f32 %v2935_v30, %v461_v17 }
 0x18a   :  { %v2569_v28 = vpop.permute.xlu2 %2568 }
 0x18b   :  { %v2571_v33 = vunpack.i.h.bf16 %v2569_v28  ;;  %v2570_v31 = vunpack.i.l.bf16 %v2569_v28  ;;  %v2420_v28 = vld [vmem:[%s3571_s3 + $0x74] sm:$0xf0] }
 0x18d   :  { %v464_v38 = vsel %vm460_vm8, %v2570_v31, %v2571_v33  ;;  %v2116_v31 = vld [vmem:[%s3571_s3 + $0xf8] sm:$0x30] }
 0x18e   :  { %v491_v39 = vmax.f32 %v2968_v3, %v464_v38 }
 0x192   :  { %v2559_v12 = vpop.permute.xlu0 %2558 }
 0x193   :  { %v2561_v13 = vunpack.i.h.bf16 %v2559_v12  ;;  %v2560_v14 = vunpack.i.l.bf16 %v2559_v12 }
 0x195   :  { %v488_v19 = vmax.f32 %v2948_v1, %v2561_v13  ;;  %v462_v22 = vsel %vm460_vm8, %v2560_v14, %v2561_v13  ;;  %v2665_v14 = vmov 0.0  }
 0x196   :  { %v487_v24 = vmax.f32 %v2946_v44, %v462_v22  ;;  %v492_v44 = vmax.f32 %v2970_v4, %v2571_v33  ;;  %682 = vst.msk [vmem:[#allocation2 + $0x3d] sm:$0x7] %vm681_vm11, %v2665_v14  ;;  %v2028_v14 = vld [vmem:[%s3571_s3 + $0x48] sm:$0xf0]  ;;  %vm1312_vm11 = vcmask 1041664  }
 0x197   :  { %v502_v25 = vpack.c.bf16 %v488_v19, %v486_v18 }
 0x198   :  { %v501_v26 = vpack.c.bf16 %v487_v24, %v485_v23 }
 0x199   :  { %1988 = vmatmul.msk.bf16.vlgmr.msra.gmra.mxu3 %vm593_vm9, %v502_v25 }
 0x19a   :  { %v2564_v27 = vpop.permute.xlu1 %2563  ;;  %621 = vmatmul.bf16.vlgmr.msra.gmra.mxu2 %v501_v26 }
 0x19b   :  { %v2566_v29 = vunpack.i.h.bf16 %v2564_v27  ;;  %v2565_v32 = vunpack.i.l.bf16 %v2564_v27  ;;  %v2050_v27 = vld [vmem:[%s3571_s3 + $0x70] sm:$0xf] }
 0x19c   :  { %v2051_v33 = vor.u32 %v2420_v28, %v2050_v27 }
 0x19d   :  { %v463_v1 = vsel %vm460_vm8, %v2565_v32, %v2566_v29  ;;  %v490_v34 = vmax.f32 %v2959_v54, %v2566_v29  ;;  %v2435_v29 = vld [vmem:[%s3571_s3 + $0xf4] sm:$0xf] }
 0x19e   :  { %v489_v30 = vmax.f32 %v2957_v2, %v463_v1  ;;  %v2419_v1 = vld [vmem:[%s3571_s3 + $0x74] sm:$0xf]  ;;  %v2119_v38 = vor.u32 %v2435_v29, %v2116_v31  ;;  %954 = vmatpush.bf16.msrb.mxu3 %v2051_v33 }
 0x19f   :  { %v504_v40 = vpack.c.bf16 %v492_v44, %v490_v34  ;;  %v2052_v34 = vld [vmem:[%s3571_s3 + $0x78] sm:$0xf0]  ;;  %v2042_v44 = vld [vmem:[%s3571_s3 + $0x60] sm:$0xf] }
 0x1a0   :  { %v503_v41 = vpack.c.bf16 %v491_v39, %v489_v30  ;;  %v2055_v30 = vor.u32 %v2419_v1, %v2052_v34  ;;  %v2418_v39 = vld [vmem:[%s3571_s3 + $0x64] sm:$0xf0]  ;;  %v2427_v1 = vld [vmem:[%s3571_s3 + $0xb4] sm:$0xf]  ;;  %v2084_v34 = vld [vmem:[%s3571_s3 + $0xb8] sm:$0xf0] }
 0x1a2   :  { %v2584_v55 = vpop.permute.xlu2 %2583  ;;  %992 = vmatpush.bf16.msrb.mxu1 %v2055_v30 }
 0x1a3   :  { %v2586_v58 = vunpack.i.h.bf16 %v2584_v55  ;;  %v2585_v60 = vunpack.i.l.bf16 %v2584_v55  ;;  %v2106_v55 = vld [vmem:[%s3571_s3 + $0xe0] sm:$0xf] }
 0x1a5   :  { %v467_v61 = vsel %vm460_vm8, %v2585_v60, %v2586_v58 }
 0x1a6   :  { %v497_v62 = vmax.f32 %v3005_v10, %v467_v61  ;;  %v2415_v61 = vld [vmem:[%s3571_s3 + $0x54] sm:$0xf] }
 0x1a9   :  { %1989 = vmatmul.msk.bf16.gmra.mxu3 %vm593_vm9, %v504_v40  ;;  %v2114_v40 = vld [vmem:[%s3571_s3 + $0xf0] sm:$0xf] }
 0x1aa   :  { %626 = vmatmul.bf16.gmra.mxu2 %v503_v41  ;;  %v2574_v42 = vpop.permute.xlu0 %2573 }
 0x1ab   :  { %v2576_v43 = vunpack.i.h.bf16 %v2574_v42  ;;  %v2575_v0 = vunpack.i.l.bf16 %v2574_v42  ;;  %v2043_v42 = vor.u32 %v2418_v39, %v2042_v44 }
 0x1ad   :  { %v465_v54 = vsel %vm460_vm8, %v2575_v0, %v2576_v43  ;;  %v494_v50 = vmax.f32 %v2981_v21, %v2576_v43  ;;  %v2436_v43 = vld [vmem:[%s3571_s3 + $0xf4] sm:$0x30]  ;;  %v2433_v0 = vld [vmem:[%s3571_s3 + $0xe4] sm:$0xf]  ;;  %955 = vmatpush.bf16.msrb.mxu3 %v2043_v42 }
 0x1ae   :  { %v493_v3 = vmax.f32 %v2979_v20, %v465_v54  ;;  %v2108_v54 = vld [vmem:[%s3571_s3 + $0xe8] sm:$0xf0] }
 0x1b2   :  { %v2579_v47 = vpop.permute.xlu1 %2578 }
 0x1b3   :  { %v2581_v48 = vunpack.i.h.bf16 %v2579_v47  ;;  %v2580_v49 = vunpack.i.l.bf16 %v2579_v47 }
 0x1b5   :  { %v496_v2 = vmax.f32 %v2992_v37, %v2581_v48  ;;  %v466_v4 = vsel %vm460_vm8, %v2580_v49, %v2581_v48  ;;  %v952_v48 = vsel %vm102_vm1, %v2119_v38, 0  ;;  %v2115_v49 = vor.u32 %v2436_v43, %v2114_v40 }
 0x1b6   :  { %v495_v51 = vmax.f32 %v2990_v36, %v466_v4  ;;  %v498_v36 = vmax.f32 %v3007_v35, %v2586_v58  ;;  %1011 = vmatpush.bf16.msrb.mxu2 %v952_v48  ;;  %v2044_v4 = vld [vmem:[%s3571_s3 + $0x68] sm:$0xf0] }
 0x1b7   :  { %v506_v52 = vpack.c.bf16 %v496_v2, %v494_v50  ;;  %v2417_v50 = vld [vmem:[%s3571_s3 + $0x64] sm:$0xf]  ;;  %v2111_v2 = vor.u32 %v2433_v0, %v2108_v54 }
 0x1b8   :  { %v505_v53 = vpack.c.bf16 %v495_v51, %v493_v3  ;;  %v2034_v3 = vld [vmem:[%s3571_s3 + $0x50] sm:$0xf]  ;;  %v2416_v51 = vld [vmem:[%s3571_s3 + $0x54] sm:$0xf0] }
 0x1b9   :  { %1990 = vmatmul.msk.bf16.gmra.mxu3 %vm593_vm9, %v506_v52  ;;  %v2589_v6 = vpop.permute.xlu0 %2588  ;;  %v2035_v58 = vor.u32 %v2416_v51, %v2034_v3  ;;  %v2410_v51 = vld [vmem:[%s3571_s3 + $0x24] sm:$0xf0] }
 0x1ba   :  { %631 = vmatmul.bf16.gmra.mxu2 %v505_v53  ;;  %v2591_v56 = vunpack.i.h.bf16 %v2589_v6  ;;  %v2590_v57 = vunpack.i.l.bf16 %v2589_v6  ;;  %v949_v53 = vsel %vm102_vm1, %v2115_v49, 0  ;;  %v2047_v6 = vor.u32 %v2417_v50, %v2044_v4  ;;  %v2411_v50 = vld [vmem:[%s3571_s3 + $0x34] sm:$0xf]  ;;  %v2010_v4 = vld [vmem:[%s3571_s3 + $0x20] sm:$0xf] }
 0x1bb   :  { %973 = vmatpush.bf16.msrb.mxu0 %v949_v53  ;;  %1012 = vmatpush.bf16.msrb.mxu2 %v2111_v2  ;;  %v2020_v2 = vld [vmem:[%s3571_s3 + $0x38] sm:$0xf0]  ;;  %v2428_v53 = vld [vmem:[%s3571_s3 + $0xb4] sm:$0xf0] }
 0x1bc   :  { %v468_v21 = vsel %vm460_vm8, %v2590_v57, %v2591_v56  ;;  %v500_v37 = vmax.f32 %v3001_v46, %v2591_v56  ;;  %v2434_v56 = vld [vmem:[%s3571_s3 + $0xe4] sm:$0xf0]  ;;  %993 = vmatpush.bf16.msrb.mxu1 %v2047_v6  ;;  %956 = vmatpush.bf16.msrb.mxu3 %v2035_v58  ;;  %v2023_v3 = vor.u32 %v2411_v50, %v2020_v2  ;;  %v2409_v58 = vld [vmem:[%s3571_s3 + $0x24] sm:$0xf] }
 0x1bd   :  { %v499_v20 = vmax.f32 %v2999_v45, %v468_v21  ;;  %v2107_v60 = vor.u32 %v2434_v56, %v2106_v55  ;;  %v2431_v21 = vld [vmem:[%s3571_s3 + $0xd4] sm:$0xf]  ;;  %v2011_v6 = vor.u32 %v2410_v51, %v2010_v4  ;;  %v2425_v56 = vld [vmem:[%s3571_s3 + $0xa4] sm:$0xf] }
 0x1be   :  { %v508_v15 = vpack.c.bf16 %v500_v37, %v498_v36  ;;  %v2100_v37 = vld [vmem:[%s3571_s3 + $0xd8] sm:$0xf0] }
 0x1bf   :  { %v507_v9 = vpack.c.bf16 %v499_v20, %v497_v62  ;;  %v2036_v36 = vld [vmem:[%s3571_s3 + $0x58] sm:$0xf0]  ;;  %v2026_v62 = vld [vmem:[%s3571_s3 + $0x40] sm:$0xf]  ;;  %974 = vmatpush.bf16.msrb.mxu0 %v2107_v60 }
 0x1c9   :  { %1991 = vmatmul.msk.bf16.gmra.mxu3 %vm593_vm9, %v508_v15  ;;  %v2414_v15 = vld [vmem:[%s3571_s3 + $0x44] sm:$0xf0]  ;;  %vm1299_vm9 = vcmask 523264  }
 0x1ca   :  { %636 = vmatmul.bf16.gmra.mxu2 %v507_v9 }
 0x21c   :  { %v651_v63 = vpop.f32.mrf.mxu3 }
 0x21d   :  { %v622_v5 = vpop.f32.mrf.mxu2 }
 0x21e   :  { %v652_v7 = vadd.f32 %v651_v63, %v622_v5  ;;  %v2103_v63 = vor.u32 %v2431_v21, %v2100_v37  ;;  %v2039_v5 = vor.u32 %v2415_v61, %v2036_v36  ;;  %v2012_v21 = vld [vmem:[%s3571_s3 + $0x28] sm:$0xf0]  ;;  %v2002_v37 = vld [vmem:[%s3571_s3 + $0x10] sm:$0xf]  ;;  %v2408_v61 = vld [vmem:[%s3571_s3 + $0x14] sm:$0xf0] }
 0x21f   :  { %v2003_v36 = vor.u32 %v2408_v61, %v2002_v37 }
 0x220   :  { %672 = vst.msk [vmem:[#allocation2] sm:$0xff] %vm671_vm10, %v652_v7  ;;  %v2098_v7 = vld [vmem:[%s3571_s3 + $0xd0] sm:$0xf]  ;;  %994 = vmatpush.bf16.msrb.mxu1 %v2039_v5  ;;  %1013 = vmatpush.bf16.msrb.mxu2 %v2103_v63  ;;  %v2068_v5 = vld [vmem:[%s3571_s3 + $0x98] sm:$0xf0] }
 0x224   :  { %v653_v46 = vpop.f32.mrf.mxu3 }
 0x225   :  { %v624_v8 = vpop.f32.mrf.mxu2 }
 0x226   :  { %v654_v16 = vadd.f32 %v653_v46, %v624_v8  ;;  %v2432_v46 = vld [vmem:[%s3571_s3 + $0xd4] sm:$0xf0]  ;;  %v2429_v8 = vld [vmem:[%s3571_s3 + $0xc4] sm:$0xf] }
 0x228   :  { %673 = vst.msk [vmem:[#allocation2 + $0x8] sm:$0xff] %vm671_vm10, %v654_v16 }
 0x22c   :  { %v656_v45 = vpop.f32.mrf.mxu3 }
 0x22d   :  { %v627_v35 = vpop.f32.mrf.mxu2 }
 0x22e   :  { %v657_v11 = vadd.f32 %v656_v45, %v627_v35  ;;  %v2092_v45 = vld [vmem:[%s3571_s3 + $0xc8] sm:$0xf0]  ;;  %v2413_v35 = vld [vmem:[%s3571_s3 + $0x44] sm:$0xf] }
 0x22f   :  { %v3082_v22 = vld [vmem:[#allocation2] ss:$2 sm:$0xff]  ;;  %v2031_v29 = vor.u32 %v2413_v35, %v2028_v14 }
 0x230   :  { %674 = vst.msk [vmem:[#allocation2 + $0x10] sm:$0xff] %vm671_vm10, %v657_v11  ;;  %v713_v25 = vrot.slane %v3082_v22, 2  ;;  %v694_v41 = vrot.slane %v3082_v22, 1  ;;  %v2406_v35 = vld [vmem:[%s3571_s3 + $0x4] sm:$0xf0] }
 0x231   :  { %995 = vmatpush.bf16.msrb.mxu1 %v2031_v29  ;;  %v2060_v14 = vld [vmem:[%s3571_s3 + $0x88] sm:$0xf0]  ;;  %v2422_v29 = vld [vmem:[%s3571_s3 + $0x84] sm:$0xf0] }
 0x234   :  { %v658_v10 = vpop.f32.mrf.mxu3 }
 0x235   :  { %v629_v12 = vpop.f32.mrf.mxu2  ;;  %996 = vmatpush.bf16.msrb.mxu1 %v2023_v3 }
 0x236   :  { %v659_v13 = vadd.f32 %v658_v10, %v629_v12  ;;  %v2027_v12 = vor.u32 %v2414_v15, %v2026_v62  ;;  %v2074_v62 = vld [vmem:[%s3571_s3 + $0xa0] sm:$0xf]  ;;  %v2426_v15 = vld [vmem:[%s3571_s3 + $0xa4] sm:$0xf0] }
 0x237   :  { %v2075_v63 = vor.u32 %v2426_v15, %v2074_v62 }
 0x238   :  { %675 = vst.msk [vmem:[#allocation2 + $0x18] sm:$0xff] %vm671_vm10, %v659_v13  ;;  %v2099_v13 = vor.u32 %v2432_v46, %v2098_v7  ;;  %957 = vmatpush.bf16.msrb.mxu3 %v2027_v12  ;;  %v2407_v7 = vld [vmem:[%s3571_s3 + $0x14] sm:$0xf]  ;;  %v2004_v46 = vld [vmem:[%s3571_s3 + $0x18] sm:$0xf0] }
 0x239   :  { %v2424_v12 = vld [vmem:[%s3571_s3 + $0x94] sm:$0xf0] }
 0x23a   :  { %975 = vmatpush.bf16.msrb.mxu0 %v2099_v13  ;;  %v2421_v13 = vld [vmem:[%s3571_s3 + $0x84] sm:$0xf] }
 0x23c   :  { %v661_v17 = vpop.f32.mrf.mxu3 }
 0x23d   :  { %v632_v18 = vpop.f32.mrf.mxu2 }
 0x23e   :  { %v662_v19 = vadd.f32 %v661_v17, %v632_v18 }
 0x23f   :  { %v3084_v24 = vld [vmem:[#allocation2 + $0x10] ss:$2 sm:$0xff] }
 0x240   :  { %676 = vst.msk [vmem:[#allocation2 + $0x20] sm:$0xff] %vm671_vm10, %v662_v19  ;;  %v714_v47 = vrot.slane %v3084_v24, 2  ;;  %v695_v52 = vrot.slane %v3084_v24, 1  ;;  %v2018_v19 = vld [vmem:[%s3571_s3 + $0x30] sm:$0xf] }
 0x242   :  { %v715_v17 = vsel %vm102_vm1, %v713_v25, %v714_v47  ;;  %v696_v18 = vsel %vm62_vm0, %v694_v41, %v695_v52  ;;  %v2095_v25 = vor.u32 %v2429_v8, %v2092_v45  ;;  %v2087_v41 = vor.u32 %v2427_v1, %v2084_v34  ;;  %v1994_v45 = vld [vmem:[%s3571_s3] sm:$0xf] }
 0x244   :  { %v663_v23 = vpop.f32.mrf.mxu3  ;;  %1014 = vmatpush.bf16.msrb.mxu2 %v2095_v25  ;;  %v2058_v25 = vld [vmem:[%s3571_s3 + $0x80] sm:$0xf] }
 0x245   :  { %v634_v26 = vpop.f32.mrf.mxu2 }
 0x246   :  { %v664_v32 = vadd.f32 %v663_v23, %v634_v26  ;;  %v2412_v23 = vld [vmem:[%s3571_s3 + $0x34] sm:$0xf0]  ;;  %v2090_v26 = vld [vmem:[%s3571_s3 + $0xc0] sm:$0xf] }
 0x247   :  { %v2019_v30 = vor.u32 %v2412_v23, %v2018_v19  ;;  %v2063_v19 = vor.u32 %v2421_v13, %v2060_v14  ;;  %v1227_v23 = vsel %vm62_vm0, 4294967295, %v2664_v59  ;;  %v1996_v59 = vld [vmem:[%s3571_s3 + $0x8] sm:$0xf0] }
 0x248   :  { %677 = vst.msk [vmem:[#allocation2 + $0x28] sm:$0xff] %vm671_vm10, %v664_v32  ;;  %v2430_v32 = vld [vmem:[%s3571_s3 + $0xc4] sm:$0xf0]  ;;  %1015 = vmatpush.bf16.msrb.mxu2 %v2087_v41 }
 0x249   :  { %v2091_v44 = vor.u32 %v2430_v32, %v2090_v26  ;;  %958 = vmatpush.bf16.msrb.mxu3 %v2019_v30  ;;  %v2448_v26 = vld [vmem:[%s3574_s6 + $0x58] sm:$0xff]  ;;  %v2405_v32 = vld [vmem:[%s3571_s3 + $0x4] sm:$0xf] }
 0x24b   :  { %976 = vmatpush.bf16.msrb.mxu0 %v2091_v44 }
 0x24c   :  { %v666_v57 = vpop.f32.mrf.mxu3 }
 0x24d   :  { %v637_v20 = vpop.f32.mrf.mxu2  ;;  %959 = vmatpush.bf16.msrb.mxu3 %v2011_v6 }
 0x24e   :  { %v667_v9 = vadd.f32 %v666_v57, %v637_v20  ;;  %v2076_v57 = vld [vmem:[%s3571_s3 + $0xa8] sm:$0xf0]  ;;  %v2015_v20 = vor.u32 %v2409_v58, %v2012_v21 }
 0x24f   :  { %v3174_v16 = vld [vmem:[#allocation2 + $0x20] ss:$2 sm:$0xff]  ;;  %v2079_v60 = vor.u32 %v2425_v56, %v2076_v57 }
 0x250   :  { %678 = vst.msk [vmem:[#allocation2 + $0x30] sm:$0xff] %vm671_vm10, %v667_v9  ;;  %v716_v11 = vrot.slane %v3174_v16, 2  ;;  %v697_v10 = vrot.slane %v3174_v16, 1  ;;  %v2423_v9 = vld [vmem:[%s3571_s3 + $0x94] sm:$0xf]  ;;  %997 = vmatpush.bf16.msrb.mxu1 %v2015_v20 }
 0x251   :  { %1016 = vmatpush.bf16.msrb.mxu2 %v2079_v60  ;;  %v2071_v8 = vor.u32 %v2423_v9, %v2068_v5  ;;  %960 = vmatpush.bf16.msrb.mxu3 %v2003_v36 }
 0x252   :  { %v717_v27 = vsel %vm102_vm1, %v714_v47, %v716_v11  ;;  %v698_v28 = vsel %vm62_vm0, %v695_v52, %v697_v10  ;;  %v2082_v52 = vld [vmem:[%s3571_s3 + $0xb0] sm:$0xf] }
 0x253   :  { %v2597_v33 = vpack.i.bf16 %v717_v27, %v715_v17  ;;  %v2592_v31 = vpack.i.bf16 %v698_v28, %v696_v18  ;;  %v2083_v55 = vor.u32 %v2428_v53, %v2082_v52  ;;  %v1995_v17 = vor.u32 %v2406_v35, %v1994_v45 }
 0x254   :  { %v668_v38 = vpop.f32.mrf.mxu3  ;;  %v1228_v27 = vsel %vm1226_vm13, %v1227_v23, 0 }
 0x255   :  { %2598 = vrot.lane.b32.xlu2 %v2597_v33, %s2666_s19  ;;  %2593 = vrot.lane.b32.xlu1 %v2592_v31, %s2667_s0  ;;  %v639_v39 = vpop.f32.mrf.mxu2  ;;  %v1230_v28 = vand.u32 %v2448_v26, %v1228_v27  ;;  %v2059_v33 = vor.u32 %v2422_v29, %v2058_v25  ;;  %v1999_v31 = vor.u32 %v2405_v32, %v1996_v59 }
 0x256   :  { %v669_v40 = vadd.f32 %v668_v38, %v639_v39  ;;  %977 = vmatpush.bf16.msrb.mxu0 %v2083_v55  ;;  %1017 = vmatpush.bf16.msrb.mxu2 %v2071_v8 }
 0x257   :  { %961 = vmatpush.bf16.msrb.mxu3 %v1995_v17 }
 0x258   :  { %680 = vst.msk [vmem:[#allocation2 + $0x38] sm:$0x1f] %vm679_vm12, %v669_v40  ;;  %vm1874_vm12 = vcmask 74752  }
 0x25a   :  { %978 = vmatpush.bf16.msrb.mxu0 %v2075_v63  ;;  %1018 = vmatpush.bf16.msrb.mxu2 %v2063_v19 }
 0x25f   :  { %v3212_v42 = vld [vmem:[#allocation2 + $0x30] ss:$2 sm:$0xff] }
 0x260   :  { %v718_v43 = vrot.slane %v3212_v42, 2  ;;  %v699_v0 = vrot.slane %v3212_v42, 1 }
 0x262   :  { %v719_v47 = vsel %vm102_vm1, %v716_v11, %v718_v43  ;;  %v700_v48 = vsel %vm62_vm0, %v697_v10, %v699_v0  ;;  %v2066_v11 = vld [vmem:[%s3571_s3 + $0x90] sm:$0xf]  ;;  %v2007_v10 = vor.u32 %v2407_v7, %v2004_v46  ;;  %vm1270_vm1 = vcmask 785408  }
 0x263   :  { %v2607_v49 = vpack.i.bf16 %v718_v43, %v719_v47  ;;  %v2602_v54 = vpack.i.bf16 %v699_v0, %v700_v48  ;;  %v2067_v18 = vor.u32 %v2424_v12, %v2066_v11 }
 0x264   :  { %998 = vmatpush.bf16.msrb.mxu1 %v2007_v10 }
 0x265   :  { %2608 = vrot.lane.b32.xlu1 %v2607_v49, %s2666_s19  ;;  %2603 = vrot.lane.b32.xlu0 %v2602_v54, %s2667_s0  ;;  %s2669_s19 = smov 96  }
 0x266   :  { %979 = vmatpush.bf16.msrb.mxu0 %v2067_v18 }
 0x268   :  { %999 = vmatpush.bf16.msrb.mxu1 %v1999_v31 }
 0x26a   :  { %980 = vmatpush.bf16.msrb.mxu0 %v2059_v33 }
 0x26e   :  { %1255 = vmatpush.bf16.msra.mxu0 %v1230_v28 }
 0x2af   :  { %v2599_v1 = vpop.permute.xlu2 %2598 }
 0x2b0   :  { %v2601_v38 = vunpack.i.h.bf16 %v2599_v1  ;;  %v2600_v30 = vunpack.i.l.bf16 %v2599_v1 }
 0x2c7   :  { %v2594_v34 = vpop.permute.xlu1 %2593 }
 0x2c8   :  { %v2596_v44 = vunpack.i.h.bf16 %v2594_v34  ;;  %v2595_v39 = vunpack.i.l.bf16 %v2594_v34 }
 0x2ca   :  { %v738_v40 = vsel %vm736_vm14, %v2596_v44, %v2601_v38  ;;  %v737_v41 = vsel %vm736_vm14, %v2595_v39, %v2600_v30  ;;  %v732_v43 = vsel %vm671_vm10, %v3082_v22, %v2595_v39  ;;  %v733_v0 = vsel %vm671_vm10, %v3084_v24, %v2596_v44 }
 0x2cb   :  { %v742_v47 = vpack.c.bf16 %v738_v40, %v737_v41  ;;  %v741_v48 = vpack.c.bf16 %v733_v0, %v732_v43 }
 0x2cd   :  { %962 = vmatmul.bf16.vlgmr.msrb.gmra.mxu3 %v741_v48  ;;  %2120 = vmatmul.msk.bf16.vlgmr.msrb.gmra.mxu0 %vm941_vm15, %v742_v47 }
 0x2ce   :  { %1000 = vmatmul.bf16.vlgmr.msrb.gmra.mxu1 %v741_v48  ;;  %2122 = vmatmul.msk.bf16.vlgmr.msrb.gmra.mxu2 %vm941_vm15, %v742_v47 }
 0x2d7   :  { %v2609_v49 = vpop.permute.xlu1 %2608  ;;  %v2604_v54 = vpop.permute.xlu0 %2603 }
 0x2d8   :  { %v2611_v50 = vunpack.i.h.bf16 %v2609_v49  ;;  %v2610_v2 = vunpack.i.l.bf16 %v2609_v49  ;;  %v2606_v4 = vunpack.i.h.bf16 %v2604_v54  ;;  %v2605_v3 = vunpack.i.l.bf16 %v2604_v54 }
 0x2da   :  { %v734_v22 = vsel %vm671_vm10, %v3174_v16, %v2605_v3  ;;  %v735_v24 = vsel %vm671_vm10, %v3212_v42, %v2606_v4  ;;  %v739_v51 = vsel %vm736_vm14, %v2605_v3, %v2610_v2  ;;  %v740_v52 = vsel %vm736_vm14, %v2606_v4, %v2611_v50  ;;  %v777_v16 = vld [vmem:[%s3572_s4] sm:$0x3]  ;;  %s2670_s4 = smov 32  }
 0x2db   :  { %v743_v53 = vpack.c.bf16 %v735_v24, %v734_v22  ;;  %v744_v6 = vpack.c.bf16 %v740_v52, %v739_v51  ;;  %v779_v57 = vperm.slane %v777_v16, 0  ;;  %v780_v42 = vperm.slane %v777_v16, 1 }
 0x2dd   :  { %967 = vmatmul.bf16.gmra.mxu3 %v743_v53  ;;  %2121 = vmatmul.msk.bf16.gmra.mxu0 %vm941_vm15, %v744_v6 }
 0x2de   :  { %1005 = vmatmul.bf16.gmra.mxu1 %v743_v53  ;;  %2123 = vmatmul.msk.bf16.gmra.mxu2 %vm941_vm15, %v744_v6 }
 0x34a   :  { %v982_v56 = vpop.f32.mrf.mxu0 }
 0x34b   :  { %v1001_v55 = vpop.f32.mrf.mxu1 }
 0x34c   :  { %v1002_v61 = vadd.f32 %v1001_v55, %v780_v42 }
 0x350   :  { %v963_v58 = vpop.f32.mrf.mxu3 }
 0x351   :  { %v1020_v60 = vpop.f32.mrf.mxu2  ;;  %v964_v21 = vadd.f32 %v963_v58, %v779_v57  ;;  %v2444_v58 = vld [vmem:[%s3574_s6 + $0x38] sm:$0xff] }
 0x352   :  { %v1021_v20 = vadd.f32 %v1020_v60, %v1002_v61  ;;  %v984_v36 = vpop.f32.mrf.mxu0  ;;  %1232 = vmatpush.bf16.msra.mxu3 %v2444_v58  ;;  %v2443_v60 = vld [vmem:[%s3574_s6 + $0x30] sm:$0xff] }
 0x353   :  { %v1003_v37 = vpop.f32.mrf.mxu1  ;;  %v983_v62 = vadd.f32 %v982_v56, %v964_v21  ;;  %v2442_v21 = vld [vmem:[%s3574_s6 + $0x28] sm:$0xff]  ;;  %v2447_v61 = vld [vmem:[%s3574_s6 + $0x50] sm:$0xff] }
 0x354   :  { %v1004_v15 = vadd.f32 %v1003_v37, %v780_v42  ;;  %v1031_v7 = vmax.f32 %v1021_v20, 0.0  ;;  %v2441_v37 = vld [vmem:[%s3574_s6 + $0x20] sm:$0xff]  ;;  %1256 = vmatpush.bf16.msra.mxu0 %v2447_v61  ;;  %v2446_v20 = vld [vmem:[%s3574_s6 + $0x48] sm:$0xff]  ;;  %v2479_v58 = vld [vmem:[%s3575_s7 + $0xf0] sm:$0xff] }
 0x355   :  { %v1030_v8 = vmax.f32 %v983_v62, 0.0  ;;  %v2439_v62 = vld [vmem:[%s3574_s6 + $0x10] sm:$0xff]  ;;  %v2478_v61 = vld [vmem:[%s3575_s7 + $0xe8] sm:$0xff] }
 0x356   :  { %v1049_v12 = vrot.slane %v1031_v7, 1  ;;  %1233 = vmatpush.bf16.msra.mxu3 %v2443_v60  ;;  %v2470_v60 = vld [vmem:[%s3575_s7 + $0xa8] sm:$0xff] }
 0x357   :  { %v1046_v14 = vrot.slane %v1030_v8, 1 }
 0x358   :  { %v965_v9 = vpop.f32.mrf.mxu3  ;;  %1257 = vmatpush.bf16.msra.mxu0 %v2446_v20  ;;  %v2469_v20 = vld [vmem:[%s3575_s7 + $0xa0] sm:$0xff] }
 0x359   :  { %v966_v63 = vadd.f32 %v965_v9, %v779_v57  ;;  %v1022_v5 = vpop.f32.mrf.mxu2  ;;  %v2445_v9 = vld [vmem:[%s3574_s6 + $0x40] sm:$0xff] }
 0x35a   :  { %v1023_v46 = vadd.f32 %v1022_v5, %v1004_v15  ;;  %v987_v18 = vpop.f32.mrf.mxu0  ;;  %1234 = vmatpush.bf16.msra.mxu3 %v2442_v21  ;;  %v2438_v15 = vld [vmem:[%s3574_s6 + $0x8] sm:$0xff] }
 0x35b   :  { %v985_v45 = vadd.f32 %v984_v36, %v966_v63  ;;  %v1006_v35 = vpop.f32.mrf.mxu1  ;;  %v2440_v36 = vld [vmem:[%s3574_s6 + $0x18] sm:$0xff]  ;;  %v2437_v63 = vld [vmem:[%s3574_s6] sm:$0xff]  ;;  %s2668_s6 = smov 64   ;;  %v2454_v21 = vld [vmem:[%s3575_s7 + $0x28] sm:$0xff] }
 0x35c   :  { %v1033_v11 = vmax.f32 %v1023_v46, 0.0  ;;  %v1007_v19 = vadd.f32 %v1006_v35, %v780_v42  ;;  %1258 = vmatpush.bf16.msra.mxu0 %v2445_v9  ;;  %v2468_v9 = vld [vmem:[%s3575_s7 + $0x98] sm:$0xff] }
 0x35d   :  { %v1032_v10 = vmax.f32 %v985_v45, 0.0 }
 0x35e   :  { %v1050_v13 = vrot.slane %v1033_v11, 1  ;;  %1235 = vmatpush.bf16.msra.mxu3 %v2441_v37  ;;  %v2462_v37 = vld [vmem:[%s3575_s7 + $0x68] sm:$0xff] }
 0x35f   :  { %v1047_v17 = vrot.slane %v1032_v10, 1 }
 0x360   :  { %v968_v23 = vpop.f32.mrf.mxu3  ;;  %v1051_v26 = vsel %vm62_vm0, %v1049_v12, %v1050_v13 }
 0x361   :  { %v969_v27 = vadd.f32 %v968_v23, %v779_v57  ;;  %v1025_v28 = vpop.f32.mrf.mxu2  ;;  %v1048_v25 = vsel %vm62_vm0, %v1046_v14, %v1047_v17  ;;  %v3330_v33 = vmax.f32 %v1031_v7, %v1051_v26 }
 0x362   :  { %v1026_v29 = vadd.f32 %v1025_v28, %v1007_v19  ;;  %v3328_v32 = vmax.f32 %v1030_v8, %v1048_v25  ;;  %v989_v48 = vpop.f32.mrf.mxu0  ;;  %1236 = vmatpush.bf16.msra.mxu3 %v2440_v36  ;;  %v2453_v36 = vld [vmem:[%s3575_s7 + $0x20] sm:$0xff] }
 0x363   :  { %v988_v59 = vadd.f32 %v987_v18, %v969_v27  ;;  %v1008_v38 = vpop.f32.mrf.mxu1 }
 0x364   :  { %v1035_v31 = vmax.f32 %v1026_v29, 0.0  ;;  %v2612_v1 = vpack.i.bf16 %v3330_v33, %v3328_v32  ;;  %v1009_v39 = vadd.f32 %v1008_v38, %v780_v42 }
 0x365   :  { %v1034_v34 = vmax.f32 %v988_v59, 0.0 }
 0x366   :  { %v1054_v30 = vrot.slane %v1035_v31, 1  ;;  %2613 = vrot.lane.b32.xlu2 %v2612_v1, %s2663_s2  ;;  %1237 = vmatpush.bf16.msra.mxu3 %v2439_v62  ;;  %v2461_v62 = vld [vmem:[%s3575_s7 + $0x60] sm:$0xff] }
 0x367   :  { %v1052_v44 = vrot.slane %v1034_v34, 1 }
 0x368   :  { %v970_v40 = vpop.f32.mrf.mxu3  ;;  %v1055_v41 = vsel %vm62_vm0, %v1050_v13, %v1054_v30 }
 0x369   :  { %v971_v43 = vadd.f32 %v970_v40, %v779_v57  ;;  %v1027_v0 = vpop.f32.mrf.mxu2  ;;  %v1053_v47 = vsel %vm62_vm0, %v1047_v17, %v1052_v44  ;;  %v1071_v50 = vmax.f32 %v1033_v11, %v1055_v41 }
 0x36a   :  { %v1028_v49 = vadd.f32 %v1027_v0, %v1009_v39  ;;  %v1070_v54 = vmax.f32 %v1032_v10, %v1053_v47  ;;  %1238 = vmatpush.bf16.msra.mxu3 %v2438_v15  ;;  %v2477_v15 = vld [vmem:[%s3575_s7 + $0xe0] sm:$0xff] }
 0x36b   :  { %v990_v2 = vadd.f32 %v989_v48, %v971_v43 }
 0x36c   :  { %v1037_v4 = vmax.f32 %v1028_v49, 0.0  ;;  %v2617_v3 = vpack.i.bf16 %v1071_v50, %v1070_v54 }
 0x36d   :  { %v1036_v22 = vmax.f32 %v990_v2, 0.0 }
 0x36e   :  { %v1058_v24 = vrot.slane %v1037_v4, 1  ;;  %2618 = vrot.lane.b32.xlu0 %v2617_v3, %s2663_s2  ;;  %1239 = vmatpush.bf16.msra.mxu3 %v2437_v63  ;;  %v2452_v63 = vld [vmem:[%s3575_s7 + $0x18] sm:$0xff] }
 0x36f   :  { %v1056_v51 = vrot.slane %v1036_v22, 1 }
 0x370   :  { %v1059_v52 = vsel %vm62_vm0, %v1054_v30, %v1058_v24  ;;  %v1075_v6 = vmax.f32 %v1037_v4, %v1058_v24 }
 0x371   :  { %v1074_v53 = vmax.f32 %v1036_v22, %v1056_v51  ;;  %v1057_v55 = vsel %vm62_vm0, %v1052_v44, %v1056_v51  ;;  %v1073_v16 = vmax.f32 %v1035_v31, %v1059_v52  ;;  %vm1219_vm0 = vcmask 515072  }
 0x372   :  { %v1072_v56 = vmax.f32 %v1034_v34, %v1057_v55  ;;  %v2464_v55 = vld [vmem:[%s3575_s7 + $0x78] sm:$0xff] }
 0x373   :  { %v2627_v57 = vpack.i.bf16 %v1075_v6, %v1074_v53  ;;  %1656 = vmatpush.bf16.msra.mxu2 %v2464_v55  ;;  %v2485_v55 = vld [vmem:[%s3577_s9] sm:$0xff] }
 0x374   :  { %v2622_v42 = vpack.i.bf16 %v1073_v16, %v1072_v56 }
 0x375   :  { %2628 = vrot.lane.b32.xlu2 %v2627_v57, %s2663_s2  ;;  %v2455_v57 = vld [vmem:[%s3575_s7 + $0x30] sm:$0xff] }
 0x376   :  { %2623 = vrot.lane.b32.xlu1 %v2622_v42, %s2663_s2  ;;  %v2463_v42 = vld [vmem:[%s3575_s7 + $0x70] sm:$0xff] }
 0x377   :  { %1657 = vmatpush.bf16.msra.mxu2 %v2463_v42  ;;  %v2499_v42 = vld [vmem:[%s3579_s11 + $0x30] sm:$0xff] }
 0x37b   :  { %1658 = vmatpush.bf16.msra.mxu2 %v2462_v37  ;;  %v2632_v37 = vld [vmem:[%s3576_s8] ss:$0 sm:$0xff] }
 0x37f   :  { %1659 = vmatpush.bf16.msra.mxu2 %v2461_v62 }
 0x3c0   :  { %v2614_v5 = vpop.permute.xlu2 %2613 }
 0x3c1   :  { %v2616_v7 = vunpack.i.h.bf16 %v2614_v5  ;;  %v2615_v46 = vunpack.i.l.bf16 %v2614_v5  ;;  %v2460_v5 = vld [vmem:[%s3575_s7 + $0x58] sm:$0xff] }
 0x3c2   :  { %1660 = vmatpush.bf16.msra.mxu2 %v2460_v5 }
 0x3c3   :  { %v1100_v45 = vsel %vm460_vm8, %v2615_v46, %v2616_v7  ;;  %v1113_v10 = vmax.f32 %v3330_v33, %v2616_v7  ;;  %v2476_v7 = vld [vmem:[%s3575_s7 + $0xd8] sm:$0xff] }
 0x3c4   :  { %v1112_v14 = vmax.f32 %v3328_v32, %v1100_v45  ;;  %v2451_v45 = vld [vmem:[%s3575_s7 + $0x10] sm:$0xff] }
 0x3cf   :  { %v2629_v26 = vpop.permute.xlu2 %2628 }
 0x3d0   :  { %v2631_v25 = vunpack.i.h.bf16 %v2629_v26  ;;  %v2630_v29 = vunpack.i.l.bf16 %v2629_v26  ;;  %v2449_v26 = vld [vmem:[%s3575_s7] sm:$0xff] }
 0x3d2   :  { %v1103_v31 = vsel %vm460_vm8, %v2630_v29, %v2631_v25  ;;  %v1119_v32 = vmax.f32 %v1075_v6, %v2631_v25  ;;  %v2456_v6 = vld [vmem:[%s3575_s7 + $0x38] sm:$0xff] }
 0x3d3   :  { %v1118_v34 = vmax.f32 %v1074_v53, %v1103_v31  ;;  %v2472_v53 = vld [vmem:[%s3575_s7 + $0xb8] sm:$0xff]  ;;  %1643 = vmatpush.bf16.msra.mxu1 %v2456_v6  ;;  %v2486_v6 = vld [vmem:[%s3577_s9 + $0x8] sm:$0xff] }
 0x3d4   :  { %1669 = vmatpush.bf16.msrb.mxu3 %v2472_v53  ;;  %v2484_v29 = vld [vmem:[%s3575_s7 + $0x118] sm:$0xff]  ;;  %v2487_v53 = vld [vmem:[%s3577_s9 + $0x10] sm:$0xff] }
 0x3d7   :  { %1644 = vmatpush.bf16.msra.mxu1 %v2455_v57 }
 0x3db   :  { %1645 = vmatpush.bf16.msra.mxu1 %v2454_v21 }
 0x3df   :  { %1646 = vmatpush.bf16.msra.mxu1 %v2453_v36  ;;  %v2497_v36 = vld [vmem:[%s3579_s11 + $0x20] sm:$0xff] }
 0x3e0   :  { %v2619_v8 = vpop.permute.xlu0 %2618 }
 0x3e1   :  { %v2621_v35 = vunpack.i.h.bf16 %v2619_v8  ;;  %v2620_v11 = vunpack.i.l.bf16 %v2619_v8  ;;  %v2467_v8 = vld [vmem:[%s3575_s7 + $0x90] sm:$0xff] }
 0x3e3   :  { %v1115_v12 = vmax.f32 %v1071_v50, %v2621_v35  ;;  %v1101_v13 = vsel %vm460_vm8, %v2620_v11, %v2621_v35  ;;  %1647 = vmatpush.bf16.msra.mxu1 %v2452_v63  ;;  %v2459_v35 = vld [vmem:[%s3575_s7 + $0x50] sm:$0xff] }
 0x3e4   :  { %v1114_v17 = vmax.f32 %v1070_v54, %v1101_v13  ;;  %v2466_v13 = vld [vmem:[%s3575_s7 + $0x88] sm:$0xff]  ;;  %1661 = vmatpush.bf16.msra.mxu2 %v2459_v35 }
 0x3e5   :  { %v1121_v18 = vpack.c.bf16 %v1115_v12, %v1113_v10  ;;  %v2475_v12 = vld [vmem:[%s3575_s7 + $0xd0] sm:$0xff] }
 0x3e6   :  { %v1120_v19 = vpack.c.bf16 %v1114_v17, %v1112_v14  ;;  %v2450_v14 = vld [vmem:[%s3575_s7 + $0x8] sm:$0xff] }
 0x3e7   :  { %2172 = vmatmul.msk.bf16.vlgmr.msra.gmra.mxu0 %vm1219_vm0, %v1121_v18  ;;  %1648 = vmatpush.bf16.msra.mxu1 %v2451_v45  ;;  %v2458_v18 = vld [vmem:[%s3575_s7 + $0x48] sm:$0xff] }
 0x3e8   :  { %v2624_v23 = vpop.permute.xlu1 %2623  ;;  %1240 = vmatmul.bf16.vlgmr.msra.gmra.mxu3 %v1120_v19  ;;  %v2474_v19 = vld [vmem:[%s3575_s7 + $0xc8] sm:$0xff]  ;;  %1662 = vmatpush.bf16.msra.mxu2 %v2458_v18 }
 0x3e9   :  { %v2626_v27 = vunpack.i.h.bf16 %v2624_v23  ;;  %v2625_v28 = vunpack.i.l.bf16 %v2624_v23  ;;  %v2465_v23 = vld [vmem:[%s3575_s7 + $0x80] sm:$0xff] }
 0x3eb   :  { %v1102_v33 = vsel %vm460_vm8, %v2625_v28, %v2626_v27  ;;  %v1117_v59 = vmax.f32 %v1073_v16, %v2626_v27  ;;  %v2471_v16 = vld [vmem:[%s3575_s7 + $0xb0] sm:$0xff]  ;;  %1649 = vmatpush.bf16.msra.mxu1 %v2450_v14  ;;  %v2457_v27 = vld [vmem:[%s3575_s7 + $0x40] sm:$0xff]  ;;  %vm1303_vm8 = vcmask 257026  }
 0x3ec   :  { %v1116_v1 = vmax.f32 %v1072_v56, %v1102_v33  ;;  %v2480_v56 = vld [vmem:[%s3575_s7 + $0xf8] sm:$0xff]  ;;  %1670 = vmatpush.bf16.msrb.mxu3 %v2471_v16  ;;  %v2473_v28 = vld [vmem:[%s3575_s7 + $0xc0] sm:$0xff]  ;;  %1663 = vmatpush.bf16.msra.mxu2 %v2457_v27  ;;  %v2483_v33 = vld [vmem:[%s3575_s7 + $0x110] sm:$0xff] }
 0x3ed   :  { %v1123_v38 = vpack.c.bf16 %v1119_v32, %v1117_v59  ;;  %1682 = vmatpush.bf16.msrb.mxu0 %v2480_v56  ;;  %vm1304_vm10 = vmor %vm1303_vm8, %vm1302_vm7  ;;  %v2500_v56 = vld [vmem:[%s3579_s11 + $0x38] sm:$0xff]  ;;  %v2493_v14 = vld [vmem:[%s3579_s11] sm:$0xff] }
 0x3ee   :  { %v1122_v30 = vpack.c.bf16 %v1118_v34, %v1116_v1  ;;  %v2482_v34 = vld [vmem:[%s3575_s7 + $0x108] sm:$0xff] }
 0x3ef   :  { %1650 = vmatpush.bf16.msra.mxu1 %v2449_v26 }
 0x3f0   :  { %1671 = vmatpush.bf16.msrb.mxu3 %v2470_v60 }
 0x3f1   :  { %1683 = vmatpush.bf16.msrb.mxu0 %v2479_v58  ;;  %v2498_v58 = vld [vmem:[%s3579_s11 + $0x28] sm:$0xff] }
 0x3f3   :  { %1861 = vmatpush.bf16.msrb.mxu1 %v2500_v56 }
 0x3f4   :  { %1672 = vmatpush.bf16.msrb.mxu3 %v2469_v20 }
 0x3f5   :  { %1684 = vmatpush.bf16.msrb.mxu0 %v2478_v61 }
 0x3f7   :  { %2173 = vmatmul.msk.bf16.gmra.mxu0 %vm1219_vm0, %v1123_v38  ;;  %1862 = vmatpush.bf16.msrb.mxu1 %v2499_v42 }
 0x3f8   :  { %1245 = vmatmul.bf16.gmra.mxu3 %v1122_v30 }
 0x3f9   :  { %1685 = vmatpush.bf16.msrb.mxu0 %v2477_v15  ;;  %1673 = vmatpush.bf16.msrb.mxu3 %v2468_v9  ;;  %v2496_v15 = vld [vmem:[%s3579_s11 + $0x18] sm:$0xff] }
 0x3fb   :  { %1863 = vmatpush.bf16.msrb.mxu1 %v2498_v58 }
 0x3fd   :  { %1686 = vmatpush.bf16.msrb.mxu0 %v2476_v7  ;;  %1674 = vmatpush.bf16.msrb.mxu3 %v2467_v8  ;;  %v2495_v7 = vld [vmem:[%s3579_s11 + $0x10] sm:$0xff] }
 0x3ff   :  { %1864 = vmatpush.bf16.msrb.mxu1 %v2497_v36 }
 0x401   :  { %1687 = vmatpush.bf16.msrb.mxu0 %v2475_v12  ;;  %1675 = vmatpush.bf16.msrb.mxu3 %v2466_v13  ;;  %v2494_v13 = vld [vmem:[%s3579_s11 + $0x8] sm:$0xff]  ;;  %s1883_s11 = sshll.u32 %s3581_s13, 4  ;;  %s1884_s11 = int_to_ptr.hbm [resolvable:$true] %s1883_s11 }
 0x403   :  { %1865 = vmatpush.bf16.msrb.mxu1 %v2496_v15 }
 0x405   :  { %1688 = vmatpush.bf16.msrb.mxu0 %v2474_v19  ;;  %1676 = vmatpush.bf16.msrb.mxu3 %v2465_v23 }
 0x407   :  { %1866 = vmatpush.bf16.msrb.mxu1 %v2495_v7 }
 0x409   :  { %1689 = vmatpush.bf16.msrb.mxu0 %v2473_v28  ;;  %1699 = vmatpush.bf16.msra.mxu3 %v2484_v29  ;;  %v2634_v28 = vld [vmem:[%s3580_s12] ss:$0 sm:$0xff] }
 0x40b   :  { %1867 = vmatpush.bf16.msrb.mxu1 %v2494_v13 }
 0x40d   :  { %1700 = vmatpush.bf16.msra.mxu3 %v2483_v33 }
 0x40f   :  { %1868 = vmatpush.bf16.msrb.mxu1 %v2493_v14 }
 0x411   :  { %1701 = vmatpush.bf16.msra.mxu3 %v2482_v34 }
 0x464   :  { %v1260_v44 = vpop.f32.mrf.mxu0 }
 0x46b   :  { %v1241_v39 = vpop.f32.mrf.mxu3 }
 0x46c   :  { %v1261_v40 = vadd.f32 %v1260_v44, %v1241_v39  ;;  %v1262_v41 = vpop.f32.mrf.mxu0  ;;  %v2481_v44 = vld [vmem:[%s3575_s7 + $0x100] sm:$0xff] }
 0x46d   :  { %1702 = vmatpush.bf16.msra.mxu3 %v2481_v44 }
 0x46e   :  { %1271 = vst.msk [vmem:[#allocation3] sm:$0xff] %vm1270_vm1, %v1261_v40  ;;  %v2492_v40 = vld [vmem:[%s3577_s9 + $0x38] sm:$0xff] }
 0x46f   :  { %1778 = vmatpush.bf16.msrb.mxu2 %v2492_v40 }
 0x473   :  { %v1243_v43 = vpop.f32.mrf.mxu3 }
 0x474   :  { %v1263_v0 = vadd.f32 %v1262_v41, %v1243_v43  ;;  %v1265_v47 = vpop.f32.mrf.mxu0 }
 0x476   :  { %1272 = vst.msk [vmem:[#allocation3 + $0x8] sm:$0xff] %vm1270_vm1, %v1263_v0 }
 0x47b   :  { %v1246_v48 = vpop.f32.mrf.mxu3 }
 0x47c   :  { %v1266_v49 = vadd.f32 %v1265_v47, %v1246_v48  ;;  %v1267_v54 = vpop.f32.mrf.mxu0 }
 0x47e   :  { %1273 = vst.msk [vmem:[#allocation3 + $0x10] sm:$0xff] %vm1270_vm1, %v1266_v49 }
 0x483   :  { %v1248_v50 = vpop.f32.mrf.mxu3 }
 0x484   :  { %v1268_v2 = vadd.f32 %v1267_v54, %v1248_v50 }
 0x485   :  { %v1294_v4 = vld [vmem:[#allocation3 + $0x4] ss:$16 sm:$0x3]  ;;  %v1282_v3 = vld [vmem:[#allocation3 + $0x2] ss:$16 sm:$0x3] }
 0x486   :  { %1275 = vst.msk [vmem:[#allocation3 + $0x18] sm:$0x1f] %vm1274_vm2, %v1268_v2  ;;  %1296 = vrot.lane.b32.xlu1 %v1294_v4, %s2668_s6  ;;  %1284 = vrot.lane.b32.xlu0 %v1282_v3, %s2669_s19  ;;  %v1278_v22 = vld [vmem:[#allocation3] ss:$16 sm:$0x3] }
 0x487   :  { %1280 = vst.msk [vmem:[#allocation4] sm:$0x3] %vm1279_vm3, %v1278_v22  ;;  %v1307_v24 = vld [vmem:[#allocation3 + $0x6] ss:$16 sm:$0x3]  ;;  %v2491_v22 = vld [vmem:[%s3577_s9 + $0x30] sm:$0xff] }
 0x488   :  { %1779 = vmatpush.bf16.msrb.mxu2 %v2491_v22 }
 0x48d   :  { %v1318_v51 = vld [vmem:[#allocation3 + $0xa] ss:$16 sm:$0x3]  ;;  %v1315_v52 = vld [vmem:[#allocation3 + $0x8] ss:$16 sm:$0x3] }
 0x48e   :  { %1309 = vrot.lane.b32.xlu0 %v1307_v24, %s2670_s4  ;;  %1320 = vrot.lane.b32.xlu2 %v1318_v51, %s2669_s19  ;;  %1316 = vst.msk [vmem:[#allocation4 + $0x6] sm:$0x3] %vm1279_vm3, %v1315_v52  ;;  %v2490_v24 = vld [vmem:[%s3577_s9 + $0x28] sm:$0xff]  ;;  %v2489_v51 = vld [vmem:[%s3577_s9 + $0x20] sm:$0xff] }
 0x48f   :  { %1780 = vmatpush.bf16.msrb.mxu2 %v2490_v24  ;;  %v2488_v52 = vld [vmem:[%s3577_s9 + $0x18] sm:$0xff] }
 0x493   :  { %1781 = vmatpush.bf16.msrb.mxu2 %v2489_v51 }
 0x497   :  { %1782 = vmatpush.bf16.msrb.mxu2 %v2488_v52 }
 0x49b   :  { %1783 = vmatpush.bf16.msrb.mxu2 %v2487_v53 }
 0x49f   :  { %1784 = vmatpush.bf16.msrb.mxu2 %v2486_v6 }
 0x4a3   :  { %1785 = vmatpush.bf16.msrb.mxu2 %v2485_v55 }
 0x4e8   :  { %v1321_v46 = vpop.permute.xlu2 %1320 }
 0x4e9   :  { %v1322_v10 = vrot.slane %v1321_v46, 6 }
 0x4eb   :  { %v1323_v17 = vsel %vm1270_vm1, %v1322_v10, %v1321_v46 }
 0x4ec   :  { %1325 = vst.msk [vmem:[#allocation4 + $0x6] sm:$0xf] %vm3457_vm6, %v1323_v17  ;;  %v2633_v17 = vld [vmem:[%s3578_s10] ss:$0 sm:$0xff] }
 0x4f3   :  { %v1327_v25 = vld [vmem:[#allocation4 + $0x8] sm:$0x3] }
 0x4f4   :  { %1332 = vst [vmem:[#allocation1 + $0x20] ss:$4 sm:$0xff] %v1327_v25 }
 0x4f8   :  { %v1297_v59 = vpop.permute.xlu1 %1296  ;;  %v1285_v31 = vpop.permute.xlu0 %1284 }
 0x4f9   :  { %v1298_v1 = vrot.slane %v1297_v59, 6  ;;  %v1286_v32 = vrot.slane %v1285_v31, 6 }
 0x4fb   :  { %v1300_v38 = vsel %vm1299_vm9, %v1298_v1, %v1297_v59  ;;  %v1287_v30 = vsel %vm1270_vm1, %v1286_v32, %v1285_v31  ;;  %v1337_v4 = vld.sshfl [vmem:[#allocation1 + $0x20] sm:$0xff pattern:$0x73625140] }
 0x4fc   :  { %1292 = vst.msk [vmem:[#allocation4] sm:$0xf] %vm3457_vm6, %v1287_v30  ;;  %v1347_v3 = vpack.c.bf16 %v1337_v4, %v1337_v4 }
 0x4fd   :  { %1305 = vst.msk [vmem:[#allocation4 + $0x2] sm:$0xf] %vm1304_vm10, %v1300_v38 }
 0x500   :  { %v1310_v39 = vpop.permute.xlu0 %1309 }
 0x501   :  { %1313 = vst.msk [vmem:[#allocation4 + $0x4] sm:$0x3] %vm1312_vm11, %v1310_v39 }
 0x508   :  { %v1326_v41 = vld [vmem:[#allocation4] sm:$0xff] }
 0x509   :  { %1330 = vst [vmem:[#allocation1] ss:$4 sm:$0xff] %v1326_v41 }
 0x510   :  { %v1333_v43 = vld.sshfl [vmem:[#allocation1] sm:$0xff pattern:$0x73625140]  ;;  %v1334_v0 = vld.sshfl [vmem:[#allocation1 + $0x8] sm:$0xff pattern:$0x73625140] }
 0x511   :  { %v1343_v47 = vpack.c.bf16 %v1333_v43, %v1333_v43  ;;  %v1344_v48 = vpack.c.bf16 %v1334_v0, %v1334_v0  ;;  %v1335_v49 = vld.sshfl [vmem:[#allocation1 + $0x10] sm:$0xff pattern:$0x73625140]  ;;  %v1336_v54 = vld.sshfl [vmem:[#allocation1 + $0x18] sm:$0xff pattern:$0x73625140] }
 0x512   :  { %v1345_v50 = vpack.c.bf16 %v1335_v49, %v1335_v49  ;;  %v1346_v2 = vpack.c.bf16 %v1336_v54, %v1336_v54 }
 0x513   :  { %1651 = vmatmul.bf16.vlgmr.msra.gmra.mxu1 %v1343_v47  ;;  %1664 = vmatmul.bf16.vlgmr.msra.gmra.mxu2 %v1344_v48 }
 0x514   :  { %1677 = vmatmul.bf16.vlgmr.msrb.gmra.mxu3 %v1345_v50  ;;  %1690 = vmatmul.bf16.vlgmr.msrb.gmra.mxu0 %v1346_v2 }
 0x524   :  { %2318 = vmatmul.msk.bf16.vlgmr.msra.gmra.mxu3 %vm1299_vm9, %v1347_v3 }
 0x590   :  { %v1652_v16 = vpop.f32.mrf.mxu1 }
 0x591   :  { %v1691_v57 = vpop.f32.mrf.mxu0  ;;  %v1653_v62 = vadd.f32 %v2632_v37, %v1652_v16 }
 0x596   :  { %v1665_v60 = vpop.f32.mrf.mxu2 }
 0x597   :  { %v1678_v21 = vpop.f32.mrf.mxu3  ;;  %v1666_v9 = vadd.f32 %v1665_v60, %v1653_v62 }
 0x598   :  { %v1654_v61 = vpop.f32.mrf.mxu1 }
 0x599   :  { %v1693_v20 = vpop.f32.mrf.mxu0  ;;  %v1679_v46 = vadd.f32 %v1678_v21, %v1666_v9 }
 0x59b   :  { %v1692_v8 = vadd.f32 %v1691_v57, %v1679_v46 }
 0x59e   :  { %v1667_v63 = vpop.f32.mrf.mxu2 }
 0x59f   :  { %v1680_v5 = vpop.f32.mrf.mxu3 }
 0x5a7   :  { %v1704_v45 = vpop.f32.mrf.mxu3 }
 0x5a8   :  { %v1705_v35 = vadd.f32 %v1704_v45, %v1692_v8 }
 0x5aa   :  { %v1708_v11 = vmax.f32 %v1705_v35, 0.0 }
 0x5ac   :  { %v1709_v10 = vpack.c.bf16 %v1708_v11, %v1708_v11 }
 0x5ae   :  { %1786 = vmatmul.bf16.vlgmr.msrb.gmra.mxu2 %v1709_v10 }
 0x5af   :  { %v1706_v12 = vpop.f32.mrf.mxu3 }
 0x631   :  { %v1787_v18 = vpop.f32.mrf.mxu2 }
 0x632   :  { %v1788_v19 = vadd.f32 %v2633_v17, %v1787_v18 }
 0x634   :  { %v1791_v23 = vmax.f32 %v1788_v19, 0.0 }
 0x636   :  { %v1792_v26 = vpack.c.bf16 %v1791_v23, %v1791_v23 }
 0x638   :  { %1869 = vmatmul.bf16.vlgmr.msrb.gmra.mxu1 %v1792_v26 }
 0x639   :  { %v1789_v27 = vpop.f32.mrf.mxu2 }
 0x6b5   :  { %v1870_v25 = vpop.f32.mrf.mxu1 }
 0x6b6   :  { %v1871_v29 = vadd.f32 %v2634_v28, %v1870_v25 }
 0x6b8   :  { %1875 = vst.msk [vmem:[#allocation5] sm:$0x3] %vm1874_vm12, %v1871_v29 }
 0x6b9   :  { %1886 = dma.vmem_to_hbm [thread:$0]  %s1882_s27, 32, %s1884_s11, [#allocation6]  }
 0x6bd   :  { %v1872_v33 = vpop.f32.mrf.mxu1 }
 0x6be   :  { %2659 = dma.done.wait [#allocation6], 32  }
 0x6bf   :  { %2660 = vsyncadd [#allocation6], 4294967264 }
 0x6c0   :  { %1891 = vsyncpa [#allocation6], 1 }

</bundles_post_ra>
